<compile_context>
chip_gen: v6e
topology: v6e:2x2x1
jax: 0.10.0
libtpu: 0.0.40
codegen_flags: <defaults>
</compile_context>

<pallas_src>
import functools
import math

import jax
import jax.numpy as jnp
from jax import lax
from jax.experimental import pallas as pl
from jax.experimental.pallas import tpu as pltpu


# --------------------------------------------------------------------------- #
# cyclic lane shift: out[:, s] = t[:, (s + delta) % hw]
# pltpu.roll is the single-XLU-op way to do this.  Its shift convention is
# specified to match jnp.roll; resolve it once with a tiny probe kernel (and
# fall back to slice+concat if the op is unavailable) so the main kernel is
# robust across toolchains.
# --------------------------------------------------------------------------- #
@functools.lru_cache(maxsize=None)
def _roll_mode():
    try:
        def probe(o_ref):
            o_ref[...] = pltpu.roll(
                lax.broadcasted_iota(jnp.int32, (8, 256), 1), 1, axis=1)

        out = pl.pallas_call(
            probe, out_shape=jax.ShapeDtypeStruct((8, 256), jnp.int32))()
        # jnp.roll convention: out[i] = in[i - shift]  ->  out[0, 1] == 0
        return "roll" if int(out[0, 1]) == 0 else "roll_neg"
    except Exception:                                   # very old toolchains
        return "concat"


# ----------------------------- Pallas kernel -------------------------------- #
def make_rdb_kernel(C, H, W, G0, G):
    HW = H * W
    Ctot = G0 + C * G
    shift_mode = _roll_mode()

    def shift_lanes(t, delta):
        """out[:, s] = t[:, (s + delta) % HW]; wrapped borders masked by caller."""
        k = delta % HW
        if k == 0:
            return t
        if shift_mode == "roll":        # pltpu.roll == jnp.roll: out[i] = in[i-shift]
            return pltpu.roll(t, HW - k, axis=1)
        if shift_mode == "roll_neg":    # out[i] = in[i+shift]
            return pltpu.roll(t, k, axis=1)
        return jnp.concatenate([t[:, k:], t[:, :k]], axis=1)

    def kernel(x_ref, w_ref, b_ref, o_ref, buf_ref):
        # x_ref  : (1, G0, HW)         f32   image, channels on sublanes, spatial on lanes
        # w_ref  : (C+1, MROWS, Ctot)  bf16  packed conv-tap weights + LFF weight
        # b_ref  : (C+1, GB, 1)        f32   packed biases (column vectors)
        # o_ref  : (1, G0, HW)         f32   lane-dense output slab
        # buf_ref: (Ctot, HW)          f32   dense feature stack (no spatial padding)
        x = x_ref[0]                                     # (G0, HW) f32, kept for residual
        buf_ref[0:G0, :] = x                             # aligned, full-lane store

        # border masks, built once per image (no vector div/mod)
        s = lax.broadcasted_iota(jnp.int32, (1, HW), 1)  # flat spatial index
        if W & (W - 1) == 0:
            col = s & (W - 1)                            # s % W for power-of-two W
        else:
            col = lax.broadcasted_iota(jnp.int32, (1, H, W), 2).reshape(1, HW)
        h_ok = {0: s >= W, 1: None, 2: s < (H - 1) * W}   # source row in range
        w_ok = {0: col >= 1, 1: None, 2: col <= W - 2}    # source col in range

        # densely connected conv3x3 + ReLU layers (torch.cat == append rows)
        for c in range(C):
            cin = G0 + c * G
            feat = buf_ref[0:cin, :].astype(jnp.bfloat16)          # (cin, HW)
            wk = w_ref[c, 0:9 * G, 0:cin]                          # (9G, cin) bf16
            # one MXU call per layer: all 9 taps, output lane dim = HW (dense)
            taps = jnp.dot(wk, feat, preferred_element_type=jnp.float32)  # (9G, HW)

            acc = taps[4 * G:5 * G, :]                             # centre tap (dh=dw=1)
            for dh in range(3):
                for dw in range(3):
                    if dh == 1 and dw == 1:
                        continue
                    idx = dh * 3 + dw
                    t = shift_lanes(taps[idx * G:(idx + 1) * G, :],
                                    (dh - 1) * W + (dw - 1))
                    parts = [m for m in (h_ok[dh], w_ok[dw]) if m is not None]
                    mask = parts[0] if len(parts) == 1 else parts[0] & parts[1]
                    acc = acc + jnp.where(mask, t, 0.0)

            out_c = jnp.maximum(acc + b_ref[c, 0:G, :], 0.0)       # bias + ReLU in f32
            buf_ref[cin:cin + G, :] = out_c                        # append new features

        # LFF (1x1 conv Ctot -> G0) + residual, residual path stays exact f32
        feat = buf_ref[...].astype(jnp.bfloat16)                   # (Ctot, HW)
        w_lff = w_ref[C, 0:G0, :]                                  # (G0, Ctot) bf16
        y = jnp.dot(w_lff, feat, preferred_element_type=jnp.float32)
        o_ref[0] = (y + b_ref[C, 0:G0, :] + x).astype(o_ref.dtype)

    return kernel


# ---------------------------- parameter packing ------------------------------ #
def pack_params(params, *, C, G0, G):
    """Pack per-layer conv weights/biases + LFF into 2 matmul-ready arrays."""
    Ctot = G0 + C * G
    MROWS = max(9 * G, G0)
    GB = max(G, G0)
    w_all = jnp.zeros((C + 1, MROWS, Ctot), jnp.float32)
    b_all = jnp.zeros((C + 1, GB, 1), jnp.float32)
    for c in range(C):
        cin = G0 + c * G
        w, b = params["convs"][c]                     # (3,3,cin,G) HWIO, (G,)
        # row index = (dh*3+dw)*G + g, column index = ci
        wm = jnp.transpose(w, (0, 1, 3, 2)).reshape(9 * G, cin)
        w_all = w_all.at[c, :9 * G, :cin].set(wm)
        b_all = b_all.at[c, :G, 0].set(b)
    w_lff, b_lff = params["lff"]                      # (G0, Ctot), (G0,)
    w_all = w_all.at[C, :G0, :].set(w_lff)
    b_all = b_all.at[C, :G0, 0].set(b_lff)
    return w_all.astype(jnp.bfloat16), b_all          # bf16 MXU operands


# ------------------------------- wrapper ------------------------------------- #
def rdb_forward(x_nchw, params, *, C, G0, G):
    N, Cin, H, W = x_nchw.shape
    assert Cin == G0, "input channels must equal growth_rate0"
    HW = H * W
    Ctot = G0 + C * G
    MROWS = max(9 * G, G0)
    GB = max(G, G0)

    w_all, b_all = pack_params(params, C=C, G0=G0, G=G)

    # NCHW is already channels-major: flattening (H, W) is free, NO transpose,
    # and the resulting last dim (H*W) is lane-dense (multiple of 128 here).
    x_flat = x_nchw.reshape(N, G0, HW)

    kernel = make_rdb_kernel(C, H, W, G0, G)
    out = pl.pallas_call(
        kernel,
        out_shape=jax.ShapeDtypeStruct((N, G0, HW), x_nchw.dtype),
        grid=(N,),
        in_specs=[
            pl.BlockSpec((1, G0, HW), lambda n: (n, 0, 0)),
            # constant index_map -> weights/biases fetched once, stay resident
            pl.BlockSpec((C + 1, MROWS, Ctot), lambda n: (0, 0, 0)),
            pl.BlockSpec((C + 1, GB, 1), lambda n: (0, 0, 0)),
        ],
        out_specs=pl.BlockSpec((1, G0, HW), lambda n: (n, 0, 0)),
        scratch_shapes=[pltpu.VMEM((Ctot, HW), jnp.float32)],
        compiler_params=pltpu.CompilerParams(
            dimension_semantics=("parallel",)),       # N=2 -> both v7x TCs busy
    )(x_flat, w_all, b_all)

    return out.reshape(N, G0, H, W)                   # free reshape back to NCHW


# ----------------------- deterministic parameter init ------------------------ #
def init_params(key, C, G0, G):
    Ctot = G0 + C * G
    keys = jax.random.split(key, 2 * C + 2)
    convs = []
    for c in range(C):
        cin = G0 + c * G
        w = jax.random.normal(keys[2 * c], (3, 3, cin, G), jnp.float32) \
            * (1.0 / math.sqrt(9 * cin))
        b = jax.random.normal(keys[2 * c + 1], (G,), jnp.float32) * 0.01
        convs.append((w, b))
    w_lff = jax.random.normal(keys[-2], (G0, Ctot), jnp.float32) \
        * (1.0 / math.sqrt(Ctot))
    b_lff = jax.random.normal(keys[-1], (G0,), jnp.float32) * 0.01
    return {"convs": convs, "lff": (w_lff, b_lff)}


# ---------------------------- pure-JAX reference ------------------------------ #
def rdb_reference(x_nchw, params, *, C, G0, G):
    feat = x_nchw
    for c in range(C):
        w, b = params["convs"][c]                      # (3,3,cin,G), (G,)
        out = lax.conv_general_dilated(
            feat, w, window_strides=(1, 1), padding="SAME",
            dimension_numbers=("NCHW", "HWIO", "NCHW"))
        out = jnp.maximum(out + b.reshape(1, -1, 1, 1), 0.0)
        feat = jnp.concatenate([feat, out], axis=1)    # torch.cat((x, out), 1)
    w_lff, b_lff = params["lff"]                       # (G0, Ctot), (G0,)
    y = jnp.einsum("gc,nchw->nghw", w_lff, feat) + b_lff.reshape(1, -1, 1, 1)
    return y + x_nchw


# ----------------------------------- main ------------------------------------- #
if __name__ == "__main__":
    G0, G, C = 8, 8, 3          # growth_rate0, growth_rate, n_conv_layers
    N, H, W = 2, 16, 16         # H*W = 256 -> lane-dense slabs

    key = jax.random.PRNGKey(0)
    kx, kp = jax.random.split(key)
    x = jax.random.normal(kx, (N, G0, H, W), jnp.float32)   # NCHW like PyTorch
    params = init_params(kp, C, G0, G)

    y = jax.block_until_ready(rdb_forward(x, params, C=C, G0=G0, G=G))
    y_ref = jax.block_until_ready(rdb_reference(x, params, C=C, G0=G0, G=G))

    assert y.shape == (N, G0, H, W)
    err = float(jnp.max(jnp.abs(y - y_ref)))
    # bf16 MXU operands (f32 accumulation) vs. an all-f32 reference ->
    # ~1e-2-scale max deviations at unit-scale activations.
    assert jnp.allclose(y, y_ref, rtol=3e-2, atol=3e-2), f"max abs err {err}"

    print("KERNEL_OK")
</pallas_src>

<mosaic_0001>
module attributes {stable_mosaic.version = 11 : i64} {
  func.func @kernel(%arg0: i32, %arg1: memref<1x8x256xf32, #tpu.memory_space<vmem>>, %arg2: memref<4x72x32xbf16, #tpu.memory_space<vmem>>, %arg3: memref<4x8x1xf32, #tpu.memory_space<vmem>>, %arg4: memref<1x8x256xf32, #tpu.memory_space<vmem>>, %arg5: memref<32x256xf32, #tpu.memory_space<vmem>>) attributes {dimension_semantics = [#tpu.dimension_semantics<parallel>], iteration_bounds = array<i64: 2>, scalar_prefetch = 0 : i64, scratch_operands = 1 : i64, tpu.core_type = #tpu.core_type<tc>, window_params = [{transform_indices = @transform_0, window_bounds = array<i64: 1, 8, 256>}, {pipeline_mode = #tpu.pipeline_mode<synchronous>, transform_indices = @transform_1, window_bounds = array<i64: 4, 72, 32>}, {pipeline_mode = #tpu.pipeline_mode<synchronous>, transform_indices = @transform_2, window_bounds = array<i64: 4, 8, 1>}, {transform_indices = @transform_3, window_bounds = array<i64: 1, 8, 256>}]} {
    %c0 = arith.constant 0 : index
    %c0_0 = arith.constant 0 : index
    %c0_1 = arith.constant 0 : index
    %0 = vector.load %arg1[%c0, %c0_0, %c0_1] : memref<1x8x256xf32, #tpu.memory_space<vmem>>, vector<1x8x256xf32>
    %1 = vector.shape_cast %0 : vector<1x8x256xf32> to vector<8x256xf32>
    %c0_2 = arith.constant 0 : index
    %c0_3 = arith.constant 0 : index
    %2 = vector.load %arg5[%c0_2, %c0_3] : memref<32x256xf32, #tpu.memory_space<vmem>>, vector<8x256xf32>
    tpu.vector_store %arg5[%c0_2, %c0_3], %1 {strides = array<i32>} : memref<32x256xf32, #tpu.memory_space<vmem>>, vector<8x256xf32>,
    %3 = tpu.iota {dimensions = array<i32: 1>} : vector<1x256xi32>
    %c15_i32 = arith.constant 15 : i32
    %4 = vector.broadcast %c15_i32 : i32 to vector<1x256xi32>
    %5 = arith.andi %3, %4 : vector<1x256xi32>
    %c16_i32 = arith.constant 16 : i32
    %6 = vector.broadcast %c16_i32 : i32 to vector<1x256xi32>
    %7 = arith.cmpi sge, %3, %6 : vector<1x256xi32>
    %c240_i32 = arith.constant 240 : i32
    %8 = vector.broadcast %c240_i32 : i32 to vector<1x256xi32>
    %9 = arith.cmpi slt, %3, %8 : vector<1x256xi32>
    %c1_i32 = arith.constant 1 : i32
    %10 = vector.broadcast %c1_i32 : i32 to vector<1x256xi32>
    %11 = arith.cmpi sge, %5, %10 : vector<1x256xi32>
    %c14_i32 = arith.constant 14 : i32
    %12 = vector.broadcast %c14_i32 : i32 to vector<1x256xi32>
    %13 = arith.cmpi sle, %5, %12 : vector<1x256xi32>
    %c0_4 = arith.constant 0 : index
    %c0_5 = arith.constant 0 : index
    %14 = vector.load %arg5[%c0_4, %c0_5] : memref<32x256xf32, #tpu.memory_space<vmem>>, vector<8x256xf32>
    %15 = arith.truncf %14 : vector<8x256xf32> to vector<8x256xbf16>
    %c0_6 = arith.constant 0 : index
    %c0_7 = arith.constant 0 : index
    %c0_8 = arith.constant 0 : index
    %16 = vector.load %arg2[%c0_6, %c0_7, %c0_8] : memref<4x72x32xbf16, #tpu.memory_space<vmem>>, vector<1x72x8xbf16>
    %17 = vector.shape_cast %16 : vector<1x72x8xbf16> to vector<72x8xbf16>
    %cst = arith.constant dense<0.000000e+00> : vector<72x256xf32>
    %18 = tpu.matmul %17, %15, %cst {dimension_numbers = #tpu.dot_dimension_numbers<[1], [0], [0], [1], [0, 0, 1, 1], [], []>} : vector<72x8xbf16>, vector<8x256xbf16>, vector<72x256xf32> -> vector<72x256xf32>
    %19 = vector.extract_strided_slice %18 {offsets = [32, 0], sizes = [8, 256], strides = [1, 1]} : vector<72x256xf32> to vector<8x256xf32>
    %20 = vector.extract_strided_slice %18 {offsets = [0, 0], sizes = [8, 256], strides = [1, 1]} : vector<72x256xf32> to vector<8x256xf32>
    %21 = vector.extract_strided_slice %20 {offsets = [0, 239], sizes = [8, 17], strides = [1, 1]} : vector<8x256xf32> to vector<8x17xf32>
    %22 = vector.extract_strided_slice %20 {offsets = [0, 0], sizes = [8, 239], strides = [1, 1]} : vector<8x256xf32> to vector<8x239xf32>
    %23 = tpu.concatenate %21, %22 in 1 : vector<8x17xf32>, vector<8x239xf32> -> vector<8x256xf32>
    %24 = arith.andi %7, %11 : vector<1x256xi1>
    %cst_9 = arith.constant 0.000000e+00 : f32
    %25 = vector.shape_cast %24 : vector<1x256xi1> to vector<1x256xi1>
    %26 = vector.broadcast %25 : vector<1x256xi1> to vector<8x256xi1>
    %27 = vector.broadcast %cst_9 : f32 to vector<8x256xf32>
    %28 = arith.select %26, %23, %27 : vector<8x256xi1>, vector<8x256xf32>
    %29 = arith.addf %19, %28 : vector<8x256xf32>
    %30 = vector.extract_strided_slice %18 {offsets = [8, 0], sizes = [8, 256], strides = [1, 1]} : vector<72x256xf32> to vector<8x256xf32>
    %31 = vector.extract_strided_slice %30 {offsets = [0, 240], sizes = [8, 16], strides = [1, 1]} : vector<8x256xf32> to vector<8x16xf32>
    %32 = vector.extract_strided_slice %30 {offsets = [0, 0], sizes = [8, 240], strides = [1, 1]} : vector<8x256xf32> to vector<8x240xf32>
    %33 = tpu.concatenate %31, %32 in 1 : vector<8x16xf32>, vector<8x240xf32> -> vector<8x256xf32>
    %cst_10 = arith.constant 0.000000e+00 : f32
    %34 = vector.shape_cast %7 : vector<1x256xi1> to vector<1x256xi1>
    %35 = vector.broadcast %34 : vector<1x256xi1> to vector<8x256xi1>
    %36 = vector.broadcast %cst_10 : f32 to vector<8x256xf32>
    %37 = arith.select %35, %33, %36 : vector<8x256xi1>, vector<8x256xf32>
    %38 = arith.addf %29, %37 : vector<8x256xf32>
    %39 = vector.extract_strided_slice %18 {offsets = [16, 0], sizes = [8, 256], strides = [1, 1]} : vector<72x256xf32> to vector<8x256xf32>
    %40 = vector.extract_strided_slice %39 {offsets = [0, 241], sizes = [8, 15], strides = [1, 1]} : vector<8x256xf32> to vector<8x15xf32>
    %41 = vector.extract_strided_slice %39 {offsets = [0, 0], sizes = [8, 241], strides = [1, 1]} : vector<8x256xf32> to vector<8x241xf32>
    %42 = tpu.concatenate %40, %41 in 1 : vector<8x15xf32>, vector<8x241xf32> -> vector<8x256xf32>
    %43 = arith.andi %7, %13 : vector<1x256xi1>
    %cst_11 = arith.constant 0.000000e+00 : f32
    %44 = vector.shape_cast %43 : vector<1x256xi1> to vector<1x256xi1>
    %45 = vector.broadcast %44 : vector<1x256xi1> to vector<8x256xi1>
    %46 = vector.broadcast %cst_11 : f32 to vector<8x256xf32>
    %47 = arith.select %45, %42, %46 : vector<8x256xi1>, vector<8x256xf32>
    %48 = arith.addf %38, %47 : vector<8x256xf32>
    %49 = vector.extract_strided_slice %18 {offsets = [24, 0], sizes = [8, 256], strides = [1, 1]} : vector<72x256xf32> to vector<8x256xf32>
    %50 = vector.extract_strided_slice %49 {offsets = [0, 255], sizes = [8, 1], strides = [1, 1]} : vector<8x256xf32> to vector<8x1xf32>
    %51 = vector.extract_strided_slice %49 {offsets = [0, 0], sizes = [8, 255], strides = [1, 1]} : vector<8x256xf32> to vector<8x255xf32>
    %52 = tpu.concatenate %50, %51 in 1 : vector<8x1xf32>, vector<8x255xf32> -> vector<8x256xf32>
    %cst_12 = arith.constant 0.000000e+00 : f32
    %53 = vector.shape_cast %11 : vector<1x256xi1> to vector<1x256xi1>
    %54 = vector.broadcast %53 : vector<1x256xi1> to vector<8x256xi1>
    %55 = vector.broadcast %cst_12 : f32 to vector<8x256xf32>
    %56 = arith.select %54, %52, %55 : vector<8x256xi1>, vector<8x256xf32>
    %57 = arith.addf %48, %56 : vector<8x256xf32>
    %58 = vector.extract_strided_slice %18 {offsets = [40, 0], sizes = [8, 256], strides = [1, 1]} : vector<72x256xf32> to vector<8x256xf32>
    %59 = vector.extract_strided_slice %58 {offsets = [0, 1], sizes = [8, 255], strides = [1, 1]} : vector<8x256xf32> to vector<8x255xf32>
    %60 = vector.extract_strided_slice %58 {offsets = [0, 0], sizes = [8, 1], strides = [1, 1]} : vector<8x256xf32> to vector<8x1xf32>
    %61 = tpu.concatenate %59, %60 in 1 : vector<8x255xf32>, vector<8x1xf32> -> vector<8x256xf32>
    %cst_13 = arith.constant 0.000000e+00 : f32
    %62 = vector.shape_cast %13 : vector<1x256xi1> to vector<1x256xi1>
    %63 = vector.broadcast %62 : vector<1x256xi1> to vector<8x256xi1>
    %64 = vector.broadcast %cst_13 : f32 to vector<8x256xf32>
    %65 = arith.select %63, %61, %64 : vector<8x256xi1>, vector<8x256xf32>
    %66 = arith.addf %57, %65 : vector<8x256xf32>
    %67 = vector.extract_strided_slice %18 {offsets = [48, 0], sizes = [8, 256], strides = [1, 1]} : vector<72x256xf32> to vector<8x256xf32>
    %68 = vector.extract_strided_slice %67 {offsets = [0, 15], sizes = [8, 241], strides = [1, 1]} : vector<8x256xf32> to vector<8x241xf32>
    %69 = vector.extract_strided_slice %67 {offsets = [0, 0], sizes = [8, 15], strides = [1, 1]} : vector<8x256xf32> to vector<8x15xf32>
    %70 = tpu.concatenate %68, %69 in 1 : vector<8x241xf32>, vector<8x15xf32> -> vector<8x256xf32>
    %71 = arith.andi %9, %11 : vector<1x256xi1>
    %cst_14 = arith.constant 0.000000e+00 : f32
    %72 = vector.shape_cast %71 : vector<1x256xi1> to vector<1x256xi1>
    %73 = vector.broadcast %72 : vector<1x256xi1> to vector<8x256xi1>
    %74 = vector.broadcast %cst_14 : f32 to vector<8x256xf32>
    %75 = arith.select %73, %70, %74 : vector<8x256xi1>, vector<8x256xf32>
    %76 = arith.addf %66, %75 : vector<8x256xf32>
    %77 = vector.extract_strided_slice %18 {offsets = [56, 0], sizes = [8, 256], strides = [1, 1]} : vector<72x256xf32> to vector<8x256xf32>
    %78 = vector.extract_strided_slice %77 {offsets = [0, 16], sizes = [8, 240], strides = [1, 1]} : vector<8x256xf32> to vector<8x240xf32>
    %79 = vector.extract_strided_slice %77 {offsets = [0, 0], sizes = [8, 16], strides = [1, 1]} : vector<8x256xf32> to vector<8x16xf32>
    %80 = tpu.concatenate %78, %79 in 1 : vector<8x240xf32>, vector<8x16xf32> -> vector<8x256xf32>
    %cst_15 = arith.constant 0.000000e+00 : f32
    %81 = vector.shape_cast %9 : vector<1x256xi1> to vector<1x256xi1>
    %82 = vector.broadcast %81 : vector<1x256xi1> to vector<8x256xi1>
    %83 = vector.broadcast %cst_15 : f32 to vector<8x256xf32>
    %84 = arith.select %82, %80, %83 : vector<8x256xi1>, vector<8x256xf32>
    %85 = arith.addf %76, %84 : vector<8x256xf32>
    %86 = vector.extract_strided_slice %18 {offsets = [64, 0], sizes = [8, 256], strides = [1, 1]} : vector<72x256xf32> to vector<8x256xf32>
    %87 = vector.extract_strided_slice %86 {offsets = [0, 17], sizes = [8, 239], strides = [1, 1]} : vector<8x256xf32> to vector<8x239xf32>
    %88 = vector.extract_strided_slice %86 {offsets = [0, 0], sizes = [8, 17], strides = [1, 1]} : vector<8x256xf32> to vector<8x17xf32>
    %89 = tpu.concatenate %87, %88 in 1 : vector<8x239xf32>, vector<8x17xf32> -> vector<8x256xf32>
    %90 = arith.andi %9, %13 : vector<1x256xi1>
    %cst_16 = arith.constant 0.000000e+00 : f32
    %91 = vector.shape_cast %90 : vector<1x256xi1> to vector<1x256xi1>
    %92 = vector.broadcast %91 : vector<1x256xi1> to vector<8x256xi1>
    %93 = vector.broadcast %cst_16 : f32 to vector<8x256xf32>
    %94 = arith.select %92, %89, %93 : vector<8x256xi1>, vector<8x256xf32>
    %95 = arith.addf %85, %94 : vector<8x256xf32>
    %c0_17 = arith.constant 0 : index
    %c0_18 = arith.constant 0 : index
    %c0_19 = arith.constant 0 : index
    %96 = vector.load %arg3[%c0_17, %c0_18, %c0_19] : memref<4x8x1xf32, #tpu.memory_space<vmem>>, vector<1x8x1xf32>
    %97 = vector.shape_cast %96 : vector<1x8x1xf32> to vector<8x1xf32>
    %98 = vector.broadcast %97 : vector<8x1xf32> to vector<8x256xf32>
    %99 = arith.addf %95, %98 : vector<8x256xf32>
    %cst_20 = arith.constant 0.000000e+00 : f32
    %100 = vector.broadcast %cst_20 : f32 to vector<8x256xf32>
    %101 = arith.maximumf %99, %100 : vector<8x256xf32>
    %c8 = arith.constant 8 : index
    %c0_21 = arith.constant 0 : index
    %102 = vector.load %arg5[%c8, %c0_21] : memref<32x256xf32, #tpu.memory_space<vmem>>, vector<8x256xf32>
    tpu.vector_store %arg5[%c8, %c0_21], %101 {strides = array<i32>} : memref<32x256xf32, #tpu.memory_space<vmem>>, vector<8x256xf32>,
    %c0_22 = arith.constant 0 : index
    %c0_23 = arith.constant 0 : index
    %103 = vector.load %arg5[%c0_22, %c0_23] : memref<32x256xf32, #tpu.memory_space<vmem>>, vector<16x256xf32>
    %104 = arith.truncf %103 : vector<16x256xf32> to vector<16x256xbf16>
    %c1 = arith.constant 1 : index
    %c0_24 = arith.constant 0 : index
    %c0_25 = arith.constant 0 : index
    %105 = vector.load %arg2[%c1, %c0_24, %c0_25] : memref<4x72x32xbf16, #tpu.memory_space<vmem>>, vector<1x72x16xbf16>
    %106 = vector.shape_cast %105 : vector<1x72x16xbf16> to vector<72x16xbf16>
    %cst_26 = arith.constant dense<0.000000e+00> : vector<72x256xf32>
    %107 = tpu.matmul %106, %104, %cst_26 {dimension_numbers = #tpu.dot_dimension_numbers<[1], [0], [0], [1], [0, 0, 1, 1], [], []>} : vector<72x16xbf16>, vector<16x256xbf16>, vector<72x256xf32> -> vector<72x256xf32>
    %108 = vector.extract_strided_slice %107 {offsets = [32, 0], sizes = [8, 256], strides = [1, 1]} : vector<72x256xf32> to vector<8x256xf32>
    %109 = vector.extract_strided_slice %107 {offsets = [0, 0], sizes = [8, 256], strides = [1, 1]} : vector<72x256xf32> to vector<8x256xf32>
    %110 = vector.extract_strided_slice %109 {offsets = [0, 239], sizes = [8, 17], strides = [1, 1]} : vector<8x256xf32> to vector<8x17xf32>
    %111 = vector.extract_strided_slice %109 {offsets = [0, 0], sizes = [8, 239], strides = [1, 1]} : vector<8x256xf32> to vector<8x239xf32>
    %112 = tpu.concatenate %110, %111 in 1 : vector<8x17xf32>, vector<8x239xf32> -> vector<8x256xf32>
    %113 = arith.andi %7, %11 : vector<1x256xi1>
    %cst_27 = arith.constant 0.000000e+00 : f32
    %114 = vector.shape_cast %113 : vector<1x256xi1> to vector<1x256xi1>
    %115 = vector.broadcast %114 : vector<1x256xi1> to vector<8x256xi1>
    %116 = vector.broadcast %cst_27 : f32 to vector<8x256xf32>
    %117 = arith.select %115, %112, %116 : vector<8x256xi1>, vector<8x256xf32>
    %118 = arith.addf %108, %117 : vector<8x256xf32>
    %119 = vector.extract_strided_slice %107 {offsets = [8, 0], sizes = [8, 256], strides = [1, 1]} : vector<72x256xf32> to vector<8x256xf32>
    %120 = vector.extract_strided_slice %119 {offsets = [0, 240], sizes = [8, 16], strides = [1, 1]} : vector<8x256xf32> to vector<8x16xf32>
    %121 = vector.extract_strided_slice %119 {offsets = [0, 0], sizes = [8, 240], strides = [1, 1]} : vector<8x256xf32> to vector<8x240xf32>
    %122 = tpu.concatenate %120, %121 in 1 : vector<8x16xf32>, vector<8x240xf32> -> vector<8x256xf32>
    %cst_28 = arith.constant 0.000000e+00 : f32
    %123 = vector.shape_cast %7 : vector<1x256xi1> to vector<1x256xi1>
    %124 = vector.broadcast %123 : vector<1x256xi1> to vector<8x256xi1>
    %125 = vector.broadcast %cst_28 : f32 to vector<8x256xf32>
    %126 = arith.select %124, %122, %125 : vector<8x256xi1>, vector<8x256xf32>
    %127 = arith.addf %118, %126 : vector<8x256xf32>
    %128 = vector.extract_strided_slice %107 {offsets = [16, 0], sizes = [8, 256], strides = [1, 1]} : vector<72x256xf32> to vector<8x256xf32>
    %129 = vector.extract_strided_slice %128 {offsets = [0, 241], sizes = [8, 15], strides = [1, 1]} : vector<8x256xf32> to vector<8x15xf32>
    %130 = vector.extract_strided_slice %128 {offsets = [0, 0], sizes = [8, 241], strides = [1, 1]} : vector<8x256xf32> to vector<8x241xf32>
    %131 = tpu.concatenate %129, %130 in 1 : vector<8x15xf32>, vector<8x241xf32> -> vector<8x256xf32>
    %132 = arith.andi %7, %13 : vector<1x256xi1>
    %cst_29 = arith.constant 0.000000e+00 : f32
    %133 = vector.shape_cast %132 : vector<1x256xi1> to vector<1x256xi1>
    %134 = vector.broadcast %133 : vector<1x256xi1> to vector<8x256xi1>
    %135 = vector.broadcast %cst_29 : f32 to vector<8x256xf32>
    %136 = arith.select %134, %131, %135 : vector<8x256xi1>, vector<8x256xf32>
    %137 = arith.addf %127, %136 : vector<8x256xf32>
    %138 = vector.extract_strided_slice %107 {offsets = [24, 0], sizes = [8, 256], strides = [1, 1]} : vector<72x256xf32> to vector<8x256xf32>
    %139 = vector.extract_strided_slice %138 {offsets = [0, 255], sizes = [8, 1], strides = [1, 1]} : vector<8x256xf32> to vector<8x1xf32>
    %140 = vector.extract_strided_slice %138 {offsets = [0, 0], sizes = [8, 255], strides = [1, 1]} : vector<8x256xf32> to vector<8x255xf32>
    %141 = tpu.concatenate %139, %140 in 1 : vector<8x1xf32>, vector<8x255xf32> -> vector<8x256xf32>
    %cst_30 = arith.constant 0.000000e+00 : f32
    %142 = vector.shape_cast %11 : vector<1x256xi1> to vector<1x256xi1>
    %143 = vector.broadcast %142 : vector<1x256xi1> to vector<8x256xi1>
    %144 = vector.broadcast %cst_30 : f32 to vector<8x256xf32>
    %145 = arith.select %143, %141, %144 : vector<8x256xi1>, vector<8x256xf32>
    %146 = arith.addf %137, %145 : vector<8x256xf32>
    %147 = vector.extract_strided_slice %107 {offsets = [40, 0], sizes = [8, 256], strides = [1, 1]} : vector<72x256xf32> to vector<8x256xf32>
    %148 = vector.extract_strided_slice %147 {offsets = [0, 1], sizes = [8, 255], strides = [1, 1]} : vector<8x256xf32> to vector<8x255xf32>
    %149 = vector.extract_strided_slice %147 {offsets = [0, 0], sizes = [8, 1], strides = [1, 1]} : vector<8x256xf32> to vector<8x1xf32>
    %150 = tpu.concatenate %148, %149 in 1 : vector<8x255xf32>, vector<8x1xf32> -> vector<8x256xf32>
    %cst_31 = arith.constant 0.000000e+00 : f32
    %151 = vector.shape_cast %13 : vector<1x256xi1> to vector<1x256xi1>
    %152 = vector.broadcast %151 : vector<1x256xi1> to vector<8x256xi1>
    %153 = vector.broadcast %cst_31 : f32 to vector<8x256xf32>
    %154 = arith.select %152, %150, %153 : vector<8x256xi1>, vector<8x256xf32>
    %155 = arith.addf %146, %154 : vector<8x256xf32>
    %156 = vector.extract_strided_slice %107 {offsets = [48, 0], sizes = [8, 256], strides = [1, 1]} : vector<72x256xf32> to vector<8x256xf32>
    %157 = vector.extract_strided_slice %156 {offsets = [0, 15], sizes = [8, 241], strides = [1, 1]} : vector<8x256xf32> to vector<8x241xf32>
    %158 = vector.extract_strided_slice %156 {offsets = [0, 0], sizes = [8, 15], strides = [1, 1]} : vector<8x256xf32> to vector<8x15xf32>
    %159 = tpu.concatenate %157, %158 in 1 : vector<8x241xf32>, vector<8x15xf32> -> vector<8x256xf32>
    %160 = arith.andi %9, %11 : vector<1x256xi1>
    %cst_32 = arith.constant 0.000000e+00 : f32
    %161 = vector.shape_cast %160 : vector<1x256xi1> to vector<1x256xi1>
    %162 = vector.broadcast %161 : vector<1x256xi1> to vector<8x256xi1>
    %163 = vector.broadcast %cst_32 : f32 to vector<8x256xf32>
    %164 = arith.select %162, %159, %163 : vector<8x256xi1>, vector<8x256xf32>
    %165 = arith.addf %155, %164 : vector<8x256xf32>
    %166 = vector.extract_strided_slice %107 {offsets = [56, 0], sizes = [8, 256], strides = [1, 1]} : vector<72x256xf32> to vector<8x256xf32>
    %167 = vector.extract_strided_slice %166 {offsets = [0, 16], sizes = [8, 240], strides = [1, 1]} : vector<8x256xf32> to vector<8x240xf32>
    %168 = vector.extract_strided_slice %166 {offsets = [0, 0], sizes = [8, 16], strides = [1, 1]} : vector<8x256xf32> to vector<8x16xf32>
    %169 = tpu.concatenate %167, %168 in 1 : vector<8x240xf32>, vector<8x16xf32> -> vector<8x256xf32>
    %cst_33 = arith.constant 0.000000e+00 : f32
    %170 = vector.shape_cast %9 : vector<1x256xi1> to vector<1x256xi1>
    %171 = vector.broadcast %170 : vector<1x256xi1> to vector<8x256xi1>
    %172 = vector.broadcast %cst_33 : f32 to vector<8x256xf32>
    %173 = arith.select %171, %169, %172 : vector<8x256xi1>, vector<8x256xf32>
    %174 = arith.addf %165, %173 : vector<8x256xf32>
    %175 = vector.extract_strided_slice %107 {offsets = [64, 0], sizes = [8, 256], strides = [1, 1]} : vector<72x256xf32> to vector<8x256xf32>
    %176 = vector.extract_strided_slice %175 {offsets = [0, 17], sizes = [8, 239], strides = [1, 1]} : vector<8x256xf32> to vector<8x239xf32>
    %177 = vector.extract_strided_slice %175 {offsets = [0, 0], sizes = [8, 17], strides = [1, 1]} : vector<8x256xf32> to vector<8x17xf32>
    %178 = tpu.concatenate %176, %177 in 1 : vector<8x239xf32>, vector<8x17xf32> -> vector<8x256xf32>
    %179 = arith.andi %9, %13 : vector<1x256xi1>
    %cst_34 = arith.constant 0.000000e+00 : f32
    %180 = vector.shape_cast %179 : vector<1x256xi1> to vector<1x256xi1>
    %181 = vector.broadcast %180 : vector<1x256xi1> to vector<8x256xi1>
    %182 = vector.broadcast %cst_34 : f32 to vector<8x256xf32>
    %183 = arith.select %181, %178, %182 : vector<8x256xi1>, vector<8x256xf32>
    %184 = arith.addf %174, %183 : vector<8x256xf32>
    %c1_35 = arith.constant 1 : index
    %c0_36 = arith.constant 0 : index
    %c0_37 = arith.constant 0 : index
    %185 = vector.load %arg3[%c1_35, %c0_36, %c0_37] : memref<4x8x1xf32, #tpu.memory_space<vmem>>, vector<1x8x1xf32>
    %186 = vector.shape_cast %185 : vector<1x8x1xf32> to vector<8x1xf32>
    %187 = vector.broadcast %186 : vector<8x1xf32> to vector<8x256xf32>
    %188 = arith.addf %184, %187 : vector<8x256xf32>
    %cst_38 = arith.constant 0.000000e+00 : f32
    %189 = vector.broadcast %cst_38 : f32 to vector<8x256xf32>
    %190 = arith.maximumf %188, %189 : vector<8x256xf32>
    %c16 = arith.constant 16 : index
    %c0_39 = arith.constant 0 : index
    %191 = vector.load %arg5[%c16, %c0_39] : memref<32x256xf32, #tpu.memory_space<vmem>>, vector<8x256xf32>
    tpu.vector_store %arg5[%c16, %c0_39], %190 {strides = array<i32>} : memref<32x256xf32, #tpu.memory_space<vmem>>, vector<8x256xf32>,
    %c0_40 = arith.constant 0 : index
    %c0_41 = arith.constant 0 : index
    %192 = vector.load %arg5[%c0_40, %c0_41] : memref<32x256xf32, #tpu.memory_space<vmem>>, vector<24x256xf32>
    %193 = arith.truncf %192 : vector<24x256xf32> to vector<24x256xbf16>
    %c2 = arith.constant 2 : index
    %c0_42 = arith.constant 0 : index
    %c0_43 = arith.constant 0 : index
    %194 = vector.load %arg2[%c2, %c0_42, %c0_43] : memref<4x72x32xbf16, #tpu.memory_space<vmem>>, vector<1x72x24xbf16>
    %195 = vector.shape_cast %194 : vector<1x72x24xbf16> to vector<72x24xbf16>
    %cst_44 = arith.constant dense<0.000000e+00> : vector<72x256xf32>
    %196 = tpu.matmul %195, %193, %cst_44 {dimension_numbers = #tpu.dot_dimension_numbers<[1], [0], [0], [1], [0, 0, 1, 1], [], []>} : vector<72x24xbf16>, vector<24x256xbf16>, vector<72x256xf32> -> vector<72x256xf32>
    %197 = vector.extract_strided_slice %196 {offsets = [32, 0], sizes = [8, 256], strides = [1, 1]} : vector<72x256xf32> to vector<8x256xf32>
    %198 = vector.extract_strided_slice %196 {offsets = [0, 0], sizes = [8, 256], strides = [1, 1]} : vector<72x256xf32> to vector<8x256xf32>
    %199 = vector.extract_strided_slice %198 {offsets = [0, 239], sizes = [8, 17], strides = [1, 1]} : vector<8x256xf32> to vector<8x17xf32>
    %200 = vector.extract_strided_slice %198 {offsets = [0, 0], sizes = [8, 239], strides = [1, 1]} : vector<8x256xf32> to vector<8x239xf32>
    %201 = tpu.concatenate %199, %200 in 1 : vector<8x17xf32>, vector<8x239xf32> -> vector<8x256xf32>
    %202 = arith.andi %7, %11 : vector<1x256xi1>
    %cst_45 = arith.constant 0.000000e+00 : f32
    %203 = vector.shape_cast %202 : vector<1x256xi1> to vector<1x256xi1>
    %204 = vector.broadcast %203 : vector<1x256xi1> to vector<8x256xi1>
    %205 = vector.broadcast %cst_45 : f32 to vector<8x256xf32>
    %206 = arith.select %204, %201, %205 : vector<8x256xi1>, vector<8x256xf32>
    %207 = arith.addf %197, %206 : vector<8x256xf32>
    %208 = vector.extract_strided_slice %196 {offsets = [8, 0], sizes = [8, 256], strides = [1, 1]} : vector<72x256xf32> to vector<8x256xf32>
    %209 = vector.extract_strided_slice %208 {offsets = [0, 240], sizes = [8, 16], strides = [1, 1]} : vector<8x256xf32> to vector<8x16xf32>
    %210 = vector.extract_strided_slice %208 {offsets = [0, 0], sizes = [8, 240], strides = [1, 1]} : vector<8x256xf32> to vector<8x240xf32>
    %211 = tpu.concatenate %209, %210 in 1 : vector<8x16xf32>, vector<8x240xf32> -> vector<8x256xf32>
    %cst_46 = arith.constant 0.000000e+00 : f32
    %212 = vector.shape_cast %7 : vector<1x256xi1> to vector<1x256xi1>
    %213 = vector.broadcast %212 : vector<1x256xi1> to vector<8x256xi1>
    %214 = vector.broadcast %cst_46 : f32 to vector<8x256xf32>
    %215 = arith.select %213, %211, %214 : vector<8x256xi1>, vector<8x256xf32>
    %216 = arith.addf %207, %215 : vector<8x256xf32>
    %217 = vector.extract_strided_slice %196 {offsets = [16, 0], sizes = [8, 256], strides = [1, 1]} : vector<72x256xf32> to vector<8x256xf32>
    %218 = vector.extract_strided_slice %217 {offsets = [0, 241], sizes = [8, 15], strides = [1, 1]} : vector<8x256xf32> to vector<8x15xf32>
    %219 = vector.extract_strided_slice %217 {offsets = [0, 0], sizes = [8, 241], strides = [1, 1]} : vector<8x256xf32> to vector<8x241xf32>
    %220 = tpu.concatenate %218, %219 in 1 : vector<8x15xf32>, vector<8x241xf32> -> vector<8x256xf32>
    %221 = arith.andi %7, %13 : vector<1x256xi1>
    %cst_47 = arith.constant 0.000000e+00 : f32
    %222 = vector.shape_cast %221 : vector<1x256xi1> to vector<1x256xi1>
    %223 = vector.broadcast %222 : vector<1x256xi1> to vector<8x256xi1>
    %224 = vector.broadcast %cst_47 : f32 to vector<8x256xf32>
    %225 = arith.select %223, %220, %224 : vector<8x256xi1>, vector<8x256xf32>
    %226 = arith.addf %216, %225 : vector<8x256xf32>
    %227 = vector.extract_strided_slice %196 {offsets = [24, 0], sizes = [8, 256], strides = [1, 1]} : vector<72x256xf32> to vector<8x256xf32>
    %228 = vector.extract_strided_slice %227 {offsets = [0, 255], sizes = [8, 1], strides = [1, 1]} : vector<8x256xf32> to vector<8x1xf32>
    %229 = vector.extract_strided_slice %227 {offsets = [0, 0], sizes = [8, 255], strides = [1, 1]} : vector<8x256xf32> to vector<8x255xf32>
    %230 = tpu.concatenate %228, %229 in 1 : vector<8x1xf32>, vector<8x255xf32> -> vector<8x256xf32>
    %cst_48 = arith.constant 0.000000e+00 : f32
    %231 = vector.shape_cast %11 : vector<1x256xi1> to vector<1x256xi1>
    %232 = vector.broadcast %231 : vector<1x256xi1> to vector<8x256xi1>
    %233 = vector.broadcast %cst_48 : f32 to vector<8x256xf32>
    %234 = arith.select %232, %230, %233 : vector<8x256xi1>, vector<8x256xf32>
    %235 = arith.addf %226, %234 : vector<8x256xf32>
    %236 = vector.extract_strided_slice %196 {offsets = [40, 0], sizes = [8, 256], strides = [1, 1]} : vector<72x256xf32> to vector<8x256xf32>
    %237 = vector.extract_strided_slice %236 {offsets = [0, 1], sizes = [8, 255], strides = [1, 1]} : vector<8x256xf32> to vector<8x255xf32>
    %238 = vector.extract_strided_slice %236 {offsets = [0, 0], sizes = [8, 1], strides = [1, 1]} : vector<8x256xf32> to vector<8x1xf32>
    %239 = tpu.concatenate %237, %238 in 1 : vector<8x255xf32>, vector<8x1xf32> -> vector<8x256xf32>
    %cst_49 = arith.constant 0.000000e+00 : f32
    %240 = vector.shape_cast %13 : vector<1x256xi1> to vector<1x256xi1>
    %241 = vector.broadcast %240 : vector<1x256xi1> to vector<8x256xi1>
    %242 = vector.broadcast %cst_49 : f32 to vector<8x256xf32>
    %243 = arith.select %241, %239, %242 : vector<8x256xi1>, vector<8x256xf32>
    %244 = arith.addf %235, %243 : vector<8x256xf32>
    %245 = vector.extract_strided_slice %196 {offsets = [48, 0], sizes = [8, 256], strides = [1, 1]} : vector<72x256xf32> to vector<8x256xf32>
    %246 = vector.extract_strided_slice %245 {offsets = [0, 15], sizes = [8, 241], strides = [1, 1]} : vector<8x256xf32> to vector<8x241xf32>
    %247 = vector.extract_strided_slice %245 {offsets = [0, 0], sizes = [8, 15], strides = [1, 1]} : vector<8x256xf32> to vector<8x15xf32>
    %248 = tpu.concatenate %246, %247 in 1 : vector<8x241xf32>, vector<8x15xf32> -> vector<8x256xf32>
    %249 = arith.andi %9, %11 : vector<1x256xi1>
    %cst_50 = arith.constant 0.000000e+00 : f32
    %250 = vector.shape_cast %249 : vector<1x256xi1> to vector<1x256xi1>
    %251 = vector.broadcast %250 : vector<1x256xi1> to vector<8x256xi1>
    %252 = vector.broadcast %cst_50 : f32 to vector<8x256xf32>
    %253 = arith.select %251, %248, %252 : vector<8x256xi1>, vector<8x256xf32>
    %254 = arith.addf %244, %253 : vector<8x256xf32>
    %255 = vector.extract_strided_slice %196 {offsets = [56, 0], sizes = [8, 256], strides = [1, 1]} : vector<72x256xf32> to vector<8x256xf32>
    %256 = vector.extract_strided_slice %255 {offsets = [0, 16], sizes = [8, 240], strides = [1, 1]} : vector<8x256xf32> to vector<8x240xf32>
    %257 = vector.extract_strided_slice %255 {offsets = [0, 0], sizes = [8, 16], strides = [1, 1]} : vector<8x256xf32> to vector<8x16xf32>
    %258 = tpu.concatenate %256, %257 in 1 : vector<8x240xf32>, vector<8x16xf32> -> vector<8x256xf32>
    %cst_51 = arith.constant 0.000000e+00 : f32
    %259 = vector.shape_cast %9 : vector<1x256xi1> to vector<1x256xi1>
    %260 = vector.broadcast %259 : vector<1x256xi1> to vector<8x256xi1>
    %261 = vector.broadcast %cst_51 : f32 to vector<8x256xf32>
    %262 = arith.select %260, %258, %261 : vector<8x256xi1>, vector<8x256xf32>
    %263 = arith.addf %254, %262 : vector<8x256xf32>
    %264 = vector.extract_strided_slice %196 {offsets = [64, 0], sizes = [8, 256], strides = [1, 1]} : vector<72x256xf32> to vector<8x256xf32>
    %265 = vector.extract_strided_slice %264 {offsets = [0, 17], sizes = [8, 239], strides = [1, 1]} : vector<8x256xf32> to vector<8x239xf32>
    %266 = vector.extract_strided_slice %264 {offsets = [0, 0], sizes = [8, 17], strides = [1, 1]} : vector<8x256xf32> to vector<8x17xf32>
    %267 = tpu.concatenate %265, %266 in 1 : vector<8x239xf32>, vector<8x17xf32> -> vector<8x256xf32>
    %268 = arith.andi %9, %13 : vector<1x256xi1>
    %cst_52 = arith.constant 0.000000e+00 : f32
    %269 = vector.shape_cast %268 : vector<1x256xi1> to vector<1x256xi1>
    %270 = vector.broadcast %269 : vector<1x256xi1> to vector<8x256xi1>
    %271 = vector.broadcast %cst_52 : f32 to vector<8x256xf32>
    %272 = arith.select %270, %267, %271 : vector<8x256xi1>, vector<8x256xf32>
    %273 = arith.addf %263, %272 : vector<8x256xf32>
    %c2_53 = arith.constant 2 : index
    %c0_54 = arith.constant 0 : index
    %c0_55 = arith.constant 0 : index
    %274 = vector.load %arg3[%c2_53, %c0_54, %c0_55] : memref<4x8x1xf32, #tpu.memory_space<vmem>>, vector<1x8x1xf32>
    %275 = vector.shape_cast %274 : vector<1x8x1xf32> to vector<8x1xf32>
    %276 = vector.broadcast %275 : vector<8x1xf32> to vector<8x256xf32>
    %277 = arith.addf %273, %276 : vector<8x256xf32>
    %cst_56 = arith.constant 0.000000e+00 : f32
    %278 = vector.broadcast %cst_56 : f32 to vector<8x256xf32>
    %279 = arith.maximumf %277, %278 : vector<8x256xf32>
    %c24 = arith.constant 24 : index
    %c0_57 = arith.constant 0 : index
    %280 = vector.load %arg5[%c24, %c0_57] : memref<32x256xf32, #tpu.memory_space<vmem>>, vector<8x256xf32>
    tpu.vector_store %arg5[%c24, %c0_57], %279 {strides = array<i32>} : memref<32x256xf32, #tpu.memory_space<vmem>>, vector<8x256xf32>,
    %c0_58 = arith.constant 0 : index
    %c0_59 = arith.constant 0 : index
    %281 = vector.load %arg5[%c0_58, %c0_59] : memref<32x256xf32, #tpu.memory_space<vmem>>, vector<32x256xf32>
    %282 = arith.truncf %281 : vector<32x256xf32> to vector<32x256xbf16>
    %c3 = arith.constant 3 : index
    %c0_60 = arith.constant 0 : index
    %c0_61 = arith.constant 0 : index
    %283 = vector.load %arg2[%c3, %c0_60, %c0_61] : memref<4x72x32xbf16, #tpu.memory_space<vmem>>, vector<1x8x32xbf16>
    %284 = vector.shape_cast %283 : vector<1x8x32xbf16> to vector<8x32xbf16>
    %cst_62 = arith.constant dense<0.000000e+00> : vector<8x256xf32>
    %285 = tpu.matmul %284, %282, %cst_62 {dimension_numbers = #tpu.dot_dimension_numbers<[1], [0], [0], [1], [0, 0, 1, 1], [], []>} : vector<8x32xbf16>, vector<32x256xbf16>, vector<8x256xf32> -> vector<8x256xf32>
    %c3_63 = arith.constant 3 : index
    %c0_64 = arith.constant 0 : index
    %c0_65 = arith.constant 0 : index
    %286 = vector.load %arg3[%c3_63, %c0_64, %c0_65] : memref<4x8x1xf32, #tpu.memory_space<vmem>>, vector<1x8x1xf32>
    %287 = vector.shape_cast %286 : vector<1x8x1xf32> to vector<8x1xf32>
    %288 = vector.broadcast %287 : vector<8x1xf32> to vector<8x256xf32>
    %289 = arith.addf %285, %288 : vector<8x256xf32>
    %290 = arith.addf %289, %1 : vector<8x256xf32>
    %c0_66 = arith.constant 0 : index
    %c0_67 = arith.constant 0 : index
    %c0_68 = arith.constant 0 : index
    %291 = vector.load %arg4[%c0_66, %c0_67, %c0_68] : memref<1x8x256xf32, #tpu.memory_space<vmem>>, vector<1x8x256xf32>
    %292 = vector.shape_cast %291 : vector<1x8x256xf32> to vector<8x256xf32>
    %293 = vector.shape_cast %290 : vector<8x256xf32> to vector<1x8x256xf32>
    tpu.vector_store %arg4[%c0_66, %c0_67, %c0_68], %293 {strides = array<i32>} : memref<1x8x256xf32, #tpu.memory_space<vmem>>, vector<1x8x256xf32>,
    return
  }
  func.func @transform_0(%arg0: i32) -> (i32, i32, i32) {
    %c0_i32 = arith.constant 0 : i32
    %c0_i32_0 = arith.constant 0 : i32
    %c0_i32_1 = arith.constant 0 : i32
    return %arg0, %c0_i32, %c0_i32_0 : i32, i32, i32
  }
  func.func @transform_1(%arg0: i32) -> (i32, i32, i32) {
    %c0_i32 = arith.constant 0 : i32
    %c0_i32_0 = arith.constant 0 : i32
    %c0_i32_1 = arith.constant 0 : i32
    %c0_i32_2 = arith.constant 0 : i32
    return %c0_i32, %c0_i32_0, %c0_i32_1 : i32, i32, i32
  }
  func.func @transform_2(%arg0: i32) -> (i32, i32, i32) {
    %c0_i32 = arith.constant 0 : i32
    %c0_i32_0 = arith.constant 0 : i32
    %c0_i32_1 = arith.constant 0 : i32
    %c0_i32_2 = arith.constant 0 : i32
    return %c0_i32, %c0_i32_0, %c0_i32_1 : i32, i32, i32
  }
  func.func @transform_3(%arg0: i32) -> (i32, i32, i32) {
    %c0_i32 = arith.constant 0 : i32
    %c0_i32_0 = arith.constant 0 : i32
    %c0_i32_1 = arith.constant 0 : i32
    return %arg0, %c0_i32, %c0_i32_0 : i32, i32, i32
  }
}

</mosaic_0001>

<bundles_post_ra>
// kernel: tpu_custom_call.1
= control target key start
LH: loop header
LB: loop body
LE: loop exit
PB: predicated region body
PF: predicated region fallthrough
CT: control target
= control target key end

     0   :  { %8 = vsyncpa [#allocation4], 0  ;;  %s1889_s0 = inlined_call_operand.vmem [shape: f32[2,8,256], index: 0, kind: input, shape index: {}]   ;;  %s1890_s1 = inlined_call_operand.vmem [shape: bf16[4,72,32], index: 1, kind: input, shape index: {}]   ;;  %s1891_s2 = inlined_call_operand.vmem [shape: f32[4,8,1], index: 2, kind: input, shape index: {}]   ;;  %s1892_s3 = inlined_call_operand.hbm [shape: f32[2,8,256], index: 3, kind: output, shape index: {}]  }
   0x1   :  { %10 = vsyncpa [#allocation4 + $0x1], 0  ;;  %s1426_s12 = smov 0   ;;  %s1428_s13 = smov 0  }
   0x2   :  { %s1430_s14 = smov 0   ;;  %s1432_s15 = smov 0  }
   0x3 LB: > { %s1447_s16 = sadd.s32 4294967295, %s1394_s15   ;;  %s1198_s17 = sadd.s32 4294967294, %s1394_s15   ;;  %s1394_s15 = sphi %s1432_s15, %s1935_s15   ;;  %s1390_s14 = sphi %s1430_s14, %s1934_s14   ;;  %s1386_s13 = sphi %s1428_s13, %s1933_s13   ;;  %s1382_s12 = sphi %s1426_s12, %s1932_s12  }
   0x4   : > { %s1451_s18 = sadd.s32 1, %s1394_s15   ;;  %s91_s19 = sadd.s32 1, %s1390_s14 }
   0x5   : > { %s88_s20 = ssub.s32 %s1394_s15, %s1451_s18  ;;  %p101_p0 = scmp.ne.s32.totalorder %s1390_s14, %s1386_s13 }
   0x6   : > { %p89_p1 = scmp.eq.s32.totalorder %s88_s20, 0  ;;  %p102_p2 = scmp.eq.s32.totalorder %s1447_s16, 1 }
   0x7   : > { %p107_p3 = scmp.ne.s32.totalorder %s1386_s13, %s1382_s12  ;;  %p108_p4 = scmp.eq.s32.totalorder %s1198_s17, 1 }
   0x8   : > { %s1462_s21 = scalar_select %p89_p1, %s1390_s14, %s91_s19  }
   0x9   : > { %p1464_p5 = por %p102_p2, %p101_p0  ;;  %p1468_p6 = por %p108_p4, %p107_p3 }
   0xa   : > { %p1201_p7 = scmp.ge.s32.totalorder %s1394_s15, 1  ;;  %p140_p8 = scmp.lt.s32.totalorder %s1394_s15, 3 }
   0xc   : > { %p141_p9 = pnand %p1201_p7, %p140_p8 }
   0xd   : > { %p164_p10 = scmp.lt.s32.totalorder (!%p141_p9), %s1447_s16, 1  ;;  %s1397_s17 = smov (!%p141_p9), 17  }
   0xe   : > { %144 = sbr.rel (%p141_p9) target bundleno = 1318 (0x526), region = 32  ;;  %s1398_s19 = smov (!%p141_p9), 113  }
   0xf   : > { %s1399_s20 = smov (!%p141_p9), 16   ;;  %s1402_s26 = smov (!%p141_p9), 127  }
  0x10   : > { %s1403_s27 = smov (!%p141_p9), 112   ;;  %s1404_s5 = smov (!%p141_p9), 111  }
  0x13   : > { %v1396_v0 = vmov 0   ;;  %s165_s24 = scalar_select %p164_p10, %s1447_s16, 1  ;;  %vm1893_vm0 = vcmask 1043456   ;;  %vm223_vm1 = vcmask 64512   ;;  %v1319_v5 = vld [vmem:[%s1890_s1] sm:$0xff]   ;;  %v1320_v7 = vld [vmem:[%s1890_s1 + $0x18] sm:$0xff]   ;;  %v174_v33 = vlaneseq }
  0x14   : > { %278 = vmatprep.mubr.bf16.mxu0 %v1396_v0  ;;  %308 = vmatprep.mubr.bf16.mxu1 %v1396_v0  ;;  %v1321_v8 = vld [vmem:[%s1890_s1 + $0x8] sm:$0xff]   ;;  %v1323_v9 = vld [vmem:[%s1890_s1 + $0x20] ss:$0 sps:$4 sm:$0xff]   ;;  %v1322_v10 = vld [vmem:[%s1890_s1 + $0x10] sm:$0xff]   ;;  %vm1896_vm3 = vcmask 138240   ;;  %vm356_vm6 = vcmask 130048  }
  0x15   : > { %1317 = vset.pattern.permute.xlu0 %v1396_v0  ;;  %1318 = vset.pattern.permute.xlu1 %v1396_v0  ;;  %s1265_s25 = sshll.u32 %s165_s24, 4  ;;  %s1400_s24 = smov 15   ;;  %v495_v31 = vld [vmem:[%s1891_s2] sm:$0xff]  ;;  %v1235_v32 = vld [vmem:[%s1891_s2 + $0x8] sm:$0xff]  ;;  %v1541_v36 = vand.u32 127, %v174_v33  ;;  %vm376_vm9 = vcmask 121856  }
  0x16   : > { %s168_s28 = scalar_lea.vmem %s1889_s0, %s1265_s25  ;;  %s1401_s25 = smov 1   ;;  %vm1898_vm11 = vcmask 7168   ;;  %vm1894_vm13 = vcmask 924672   ;;  %vm1895_vm15 = vcmask 1039360   ;;  %v1257_v53 = vld [vmem:[%s1890_s1 + $0x6c] sm:$0xf] }
  0x17   : > { %v1483_v1 = vld [vmem:[%s168_s28 + $0x8] sm:$0xff]  ;;  %v1485_v2 = vld [vmem:[%s168_s28] sm:$0xff]  ;;  %v1544_v39 = vadd.s32 128, %v1541_v36  ;;  %v177_v40 = vand.u32 15, %v1541_v36  ;;  %vm1897_vm2 = vcmp.ge.s32.totalorder %v1541_v36, 16 }
  0x18   : > { %v190_v3 = vpack.c.bf16 %v1483_v1, %v1483_v1  ;;  %v189_v4 = vpack.c.bf16 %v1485_v2, %v1485_v2 }
  0x19   : > { %v178_v43 = vand.u32 15, %v1544_v39  ;;  %vm1549_vm4 = vcmp.ge.s32.totalorder %v177_v40, 1  ;;  %vm1571_vm8 = vcmp.le.s32.totalorder %v177_v40, 14  ;;  %vm182_vm14 = vcmp.lt.s32.totalorder %v1544_v39, 240 }
  0x1a   : > { %1210 = vmatprep.subr.msk.bf16.mxu0 %vm1893_vm0, %v190_v3  ;;  %1267 = vmatprep.subr.msk.bf16.mxu1 %vm1893_vm0, %v190_v3  ;;  %v241_v6 = vsel %vm1893_vm0, %v189_v4, 0  ;;  %vm1557_vm5 = vmand %vm1897_vm2, %vm1549_vm4  ;;  %vm459_vm0 = vcmask 916480  }
  0x1b   : > { %261 = vmatpush1.bf16.msra.mxu0 %v241_v6  ;;  %1268 = vmatpush1.bf16.msra.mxu1 %v241_v6  ;;  %vm1563_vm7 = vcmp.ge.s32.totalorder %v178_v43, 1  ;;  %vm1576_vm10 = vcmp.le.s32.totalorder %v178_v43, 14  ;;  %vm1584_vm12 = vmand %vm1897_vm2, %vm1571_vm8 }
  0x1e   : > { %1211 = vmatmul.mubr.msk.bf16.vlgmr.msra.gmra.mxu0 %vm223_vm1, %v1319_v5  ;;  %1214 = vmatmul.mubr.msk.bf16.vlgmr.msra.gmra.mxu1 %vm223_vm1, %v1320_v7 }
  0x1f   : > { %288 = vmatprep.mubr.bf16.mxu0 %v1396_v0  ;;  %318 = vmatprep.mubr.bf16.mxu1 %v1396_v0 }
  0x26   : > { %1212 = vmatmul.mubr.msk.bf16.gmra.mxu0 %vm223_vm1, %v1321_v8  ;;  %1215 = vmatmul.mubr.msk.bf16.gmra.mxu1 %vm223_vm1, %v1323_v9 }
  0x27   : > { %298 = vmatprep.mubr.bf16.mxu0 %v1396_v0  ;;  %593 = vmatprep.mubr.bf16.mxu1 %v1396_v0 }
  0x2e   : > { %1213 = vmatmul.mubr.msk.bf16.gmra.mxu0 %vm223_vm1, %v1322_v10  ;;  %vm1610_vm1 = vmand %vm182_vm14, %vm1563_vm7 }
  0x2f   : > { %872 = vmatprep.mubr.bf16.mxu0 %v1396_v0 }
  0xde   : > { %v280_v11 = vpop.f32.mrf.mxu0  ;;  %v310_v12 = vpop.f32.mrf.mxu1 }
  0xdf   : > { %332 = vrot.lane.b32.xlu0 %v280_v11, %s1397_s17 }
  0xe0   : > { %v282_v13 = vpop.f32.mrf.mxu0  ;;  %v312_v14 = vpop.f32.mrf.mxu1 }
  0xe1   : > { %435 = vrot.lane.b32.xlu1 %v312_v14, %s1398_s19 }
  0xe2   : > { %v284_v15 = vpop.f32.mrf.mxu0  ;;  %v314_v16 = vpop.f32.mrf.mxu1 }
  0xe3   : > { %433 = vrot.lane.b32.xlu0 %v310_v12, %s1398_s19 }
  0xe4   : > { %v286_v17 = vpop.f32.mrf.mxu0  ;;  %v316_v18 = vpop.f32.mrf.mxu1 }
  0xe5   : > { %354 = vrot.lane.b32.xlu1 %v284_v15, %s1399_s20 }
  0xe6   : > { %v290_v19 = vpop.f32.mrf.mxu0  ;;  %v320_v20 = vpop.f32.mrf.mxu1 }
  0xe7   : > { %328 = vrot.lane.b32.xlu0 %v282_v13, %s1397_s17 }
  0xe8   : > { %v292_v21 = vpop.f32.mrf.mxu0  ;;  %v322_v22 = vpop.f32.mrf.mxu1 }
  0xe9   : > { %350 = vrot.lane.b32.xlu1 %v286_v17, %s1399_s20 }
  0xea   : > { %v294_v23 = vpop.f32.mrf.mxu0  ;;  %v324_v24 = vpop.f32.mrf.mxu1 }
  0xeb   : > { %370 = vrot.lane.b32.xlu0 %v292_v21, %s1400_s24 }
  0xec   : > { %v296_v25 = vpop.f32.mrf.mxu0  ;;  %v325_v26 = vpop.f32.mrf.mxu1 }
  0xed   : > { %374 = vrot.lane.b32.xlu1 %v290_v19, %s1400_s24 }
  0xee   : > { %v300_v27 = vpop.f32.mrf.mxu0 }
  0xef   : > { %392 = vrot.lane.b32.xlu0 %v296_v25, %s1401_s25 }
  0xf0   : > { %v302_v28 = vpop.f32.mrf.mxu0 }
  0xf1   : > { %396 = vrot.lane.b32.xlu1 %v294_v23, %s1401_s25 }
  0xf2   : > { %v304_v29 = vpop.f32.mrf.mxu0 }
  0xf3   : > { %413 = vrot.lane.b32.xlu0 %v304_v29, %s1402_s26 }
  0xf4   : > { %v306_v30 = vpop.f32.mrf.mxu0 }
  0xf5   : > { %457 = vrot.lane.b32.xlu1 %v316_v18, %s1403_s27 }
  0xf7   : > { %455 = vrot.lane.b32.xlu0 %v314_v16, %s1403_s27 }
  0xf9   : > { %415 = vrot.lane.b32.xlu1 %v306_v30, %s1402_s26 }
  0xfb   : > { %498 = vperm.xlu0 %1317, %v495_v31  }
  0xfd   : > { %475 = vrot.lane.b32.xlu1 %v320_v20, %s1404_s5 }
  0xff   : > { %766 = vperm.xlu0 %1317, %v1235_v32  }
 0x101   : > { %477 = vrot.lane.b32.xlu1 %v322_v22, %s1404_s5 }
 0x151   : > { %v333_v34 = vpop.permute.xlu0 %332 }
 0x153   : > { %v436_v35 = vpop.permute.xlu1 %435 }
 0x155   : > { %v434_v37 = vpop.permute.xlu0 %433 }
 0x156   : > { %v438_v16 = vsel %vm1894_vm13, %v434_v37, %v436_v35  ;;  %v442_v17 = vsel %vm1894_vm13, %v436_v35, %v434_v37  ;;  %vm479_vm13 = vcmask 908288  }
 0x157   : > { %v355_v38 = vpop.permute.xlu1 %354  ;;  %v449_v29 = vsel %vm1549_vm4, %v438_v16, 0.0  ;;  %v450_v30 = vsel %vm1610_vm1, %v442_v17, 0.0 }
 0x159   : > { %v329_v41 = vpop.permute.xlu0 %328 }
 0x15a   : > { %v335_v47 = vsel %vm1896_vm3, %v333_v34, %v329_v41  ;;  %v338_v48 = vsel %vm1896_vm3, %v329_v41, %v333_v34 }
 0x15b   : > { %v351_v42 = vpop.permute.xlu1 %350  ;;  %v345_v51 = vsel %vm1557_vm5, %v338_v48, 0.0  ;;  %v346_v52 = vsel %vm1563_vm7, %v335_v47, 0.0 }
 0x15c   : > { %v360_v55 = vsel %vm356_vm6, %v351_v42, %v355_v38  ;;  %v347_v58 = vadd.f32 %v345_v51, %v300_v27  ;;  %v348_v59 = vadd.f32 %v346_v52, %v302_v28  ;;  %v357_v63 = vsel %vm356_vm6, %v355_v38, %v351_v42 }
 0x15d   : > { %v371_v45 = vpop.permute.xlu0 %370  ;;  %v365_v3 = vsel %vm1897_vm2, %v360_v55, 0.0 }
 0x15e   : > { %v367_v10 = vadd.f32 %v365_v3, %v347_v58  ;;  %v368_v11 = vadd.f32 %v357_v63, %v348_v59  ;;  %v1325_v63 = vld [vmem:[%s1890_s1 + $0x2c] sm:$0xff]   ;;  %v1326_v3 = vld [vmem:[%s1890_s1 + $0x34] sm:$0xff]  }
 0x15f   : > { %v375_v49 = vpop.permute.xlu1 %374 }
 0x160   : > { %v377_v61 = vsel %vm376_vm9, %v375_v49, %v371_v45  ;;  %v380_v62 = vsel %vm376_vm9, %v371_v45, %v375_v49 }
 0x161   : > { %v393_v54 = vpop.permute.xlu0 %392  ;;  %v387_v6 = vsel %vm1584_vm12, %v380_v62, 0.0  ;;  %v388_v7 = vsel %vm1576_vm10, %v377_v61, 0.0  ;;  %v1324_v62 = vld [vmem:[%s1890_s1 + $0x24] sm:$0xff]  }
 0x162   : > { %v389_v14 = vadd.f32 %v387_v6, %v367_v10  ;;  %v390_v15 = vadd.f32 %v388_v7, %v368_v11 }
 0x163   : > { %v397_v57 = vpop.permute.xlu1 %396 }
 0x164   : > { %v399_v4 = vsel %vm1898_vm11, %v397_v57, %v393_v54  ;;  %v402_v5 = vsel %vm1898_vm11, %v393_v54, %v397_v57 }
 0x165   : > { %v414_v8 = vpop.permute.xlu0 %413  ;;  %v407_v12 = vsel %vm1549_vm4, %v402_v5, 0.0  ;;  %v408_v13 = vsel %vm1563_vm7, %v399_v4, 0.0  ;;  %v1327_v4 = vld [vmem:[%s1890_s1 + $0x3c] sm:$0xff]   ;;  %v1328_v5 = vld [vmem:[%s1890_s1 + $0x44] ss:$0 sps:$4 sm:$0xff]  }
 0x166   : > { %v409_v20 = vadd.f32 %v407_v12, %v389_v14  ;;  %v410_v21 = vadd.f32 %v408_v13, %v390_v15 }
 0x167   : > { %v458_v9 = vpop.permute.xlu1 %457 }
 0x169   : > { %v456_v24 = vpop.permute.xlu0 %455 }
 0x16a   : > { %v464_v32 = vsel %vm459_vm0, %v458_v9, %v456_v24  ;;  %v460_v37 = vsel %vm459_vm0, %v456_v24, %v458_v9 }
 0x16b   : > { %v416_v18 = vpop.permute.xlu1 %415  ;;  %v470_v38 = vsel %vm182_vm14, %v464_v32, 0.0 }
 0x16c   : > { %v418_v22 = vsel %vm1895_vm15, %v414_v8, %v416_v18  ;;  %v422_v23 = vsel %vm1895_vm15, %v416_v18, %v414_v8  ;;  %vm1629_vm15 = vmand %vm182_vm14, %vm1576_vm10 }
 0x16d   : > { %v427_v25 = vsel %vm1571_vm8, %v418_v22, 0.0  ;;  %v428_v26 = vsel %vm1576_vm10, %v422_v23, 0.0 }
 0x16e   : > { %v429_v27 = vadd.f32 %v427_v25, %v409_v20  ;;  %v430_v28 = vadd.f32 %v428_v26, %v410_v21 }
 0x16f   : > { %v476_v31 = vpop.permute.xlu1 %475 }
 0x170   : > { %v451_v33 = vadd.f32 %v449_v29, %v429_v27  ;;  %v452_v34 = vadd.f32 %v450_v30, %v430_v28  ;;  %v1256_v27 = vld [vmem:[%s1891_s2 + $0x10] sm:$0xff] }
 0x172   : > { %v471_v43 = vadd.f32 %v460_v37, %v451_v33  ;;  %v472_v45 = vadd.f32 %v470_v38, %v452_v34 }
 0x173   : > { %v478_v40 = vpop.permute.xlu1 %477 }
 0x174   : > { %v480_v41 = vsel %vm479_vm13, %v476_v31, %v478_v40  ;;  %v484_v42 = vsel %vm479_vm13, %v478_v40, %v476_v31 }
 0x175   : > { %v491_v47 = vsel %vm1571_vm8, %v480_v41, 0.0  ;;  %v492_v48 = vsel %vm1629_vm15, %v484_v42, 0.0 }
 0x176   : > { %v499_v49 = vpop.permute.xlu0 %498  ;;  %v493_v51 = vadd.f32 %v491_v47, %v471_v43  ;;  %v494_v52 = vadd.f32 %v492_v48, %v472_v45 }
 0x178   : > { %v501_v54 = vadd.f32 %v499_v49, %v493_v51  ;;  %v502_v55 = vadd.f32 %v499_v49, %v494_v52 }
 0x17a   : > { %v503_v57 = vmax.f32 %v501_v54, 0.0  ;;  %v504_v58 = vmax.f32 %v502_v55, 0.0  ;;  %v1694_v28 = vpop.permute.xlu0 %766 }
 0x17c   : > { %v1643_v59 = vpack.c.bf16 %v503_v57, %v1485_v2  ;;  %v1646_v61 = vpack.c.bf16 %v504_v58, %v1483_v1 }
 0x17e   : > { %575 = vmatprep.subr.bf16.mxu1 %v1646_v61 }
 0x17f   : > { %576 = vmatpush1.bf16.msra.mxu1 %v1643_v59 }
 0x182   : > { %1230 = vmatmul.mubr.msk.bf16.vlgmr.msra.gmra.mxu1 %vm356_vm6, %v1324_v62 }
 0x183   : > { %603 = vmatprep.mubr.bf16.mxu1 %v1396_v0 }
 0x18a   : > { %1231 = vmatmul.mubr.msk.bf16.gmra.mxu1 %vm356_vm6, %v1325_v63 }
 0x18b   : > { %613 = vmatprep.mubr.bf16.mxu1 %v1396_v0 }
 0x192   : > { %1232 = vmatmul.mubr.msk.bf16.gmra.mxu1 %vm356_vm6, %v1326_v3 }
 0x193   : > { %623 = vmatprep.mubr.bf16.mxu1 %v1396_v0 }
 0x19a   : > { %1233 = vmatmul.mubr.msk.bf16.gmra.mxu1 %vm356_vm6, %v1327_v4 }
 0x19b   : > { %633 = vmatprep.mubr.bf16.mxu1 %v1396_v0 }
 0x1a2   : > { %1234 = vmatmul.mubr.msk.bf16.gmra.mxu1 %vm356_vm6, %v1328_v5 }
 0x1a3   : > { %1111 = vmatprep.mubr.bf16.mxu1 %v1396_v0 }
 0x242   : > { %v595_v6 = vpop.f32.mrf.mxu1 }
 0x243   : > { %647 = vrot.lane.b32.xlu1 %v595_v6, %s1397_s17 }
 0x244   : > { %v597_v7 = vpop.f32.mrf.mxu1 }
 0x245   : > { %643 = vrot.lane.b32.xlu0 %v597_v7, %s1397_s17 }
 0x246   : > { %v599_v8 = vpop.f32.mrf.mxu1 }
 0x247   : > { %662 = vrot.lane.b32.xlu1 %v599_v8, %s1399_s20 }
 0x248   : > { %v601_v9 = vpop.f32.mrf.mxu1 }
 0x249   : > { %658 = vrot.lane.b32.xlu0 %v601_v9, %s1399_s20 }
 0x24a   : > { %v605_v10 = vpop.f32.mrf.mxu1 }
 0x24b   : > { %677 = vrot.lane.b32.xlu1 %v605_v10, %s1400_s24 }
 0x24c   : > { %v607_v11 = vpop.f32.mrf.mxu1 }
 0x24d   : > { %673 = vrot.lane.b32.xlu0 %v607_v11, %s1400_s24 }
 0x24e   : > { %v609_v12 = vpop.f32.mrf.mxu1 }
 0x24f   : > { %692 = vrot.lane.b32.xlu1 %v609_v12, %s1401_s25 }
 0x250   : > { %v611_v13 = vpop.f32.mrf.mxu1 }
 0x251   : > { %688 = vrot.lane.b32.xlu0 %v611_v13, %s1401_s25 }
 0x252   : > { %v615_v14 = vpop.f32.mrf.mxu1 }
 0x254   : > { %v617_v15 = vpop.f32.mrf.mxu1 }
 0x256   : > { %v619_v16 = vpop.f32.mrf.mxu1 }
 0x257   : > { %704 = vrot.lane.b32.xlu0 %v619_v16, %s1402_s26 }
 0x258   : > { %v621_v17 = vpop.f32.mrf.mxu1 }
 0x259   : > { %706 = vrot.lane.b32.xlu1 %v621_v17, %s1402_s26 }
 0x25a   : > { %v625_v18 = vpop.f32.mrf.mxu1 }
 0x25b   : > { %719 = vrot.lane.b32.xlu0 %v625_v18, %s1398_s19 }
 0x25c   : > { %v627_v20 = vpop.f32.mrf.mxu1 }
 0x25d   : > { %721 = vrot.lane.b32.xlu1 %v627_v20, %s1398_s19 }
 0x25e   : > { %v629_v21 = vpop.f32.mrf.mxu1 }
 0x25f   : > { %734 = vrot.lane.b32.xlu0 %v629_v21, %s1403_s27 }
 0x260   : > { %v631_v22 = vpop.f32.mrf.mxu1 }
 0x261   : > { %736 = vrot.lane.b32.xlu1 %v631_v22, %s1403_s27 }
 0x262   : > { %v635_v23 = vpop.f32.mrf.mxu1 }
 0x264   : > { %v637_v24 = vpop.f32.mrf.mxu1 }
 0x265   : > { %749 = vrot.lane.b32.xlu1 %v635_v23, %s1404_s5  ;;  %751 = vrot.lane.b32.xlu0 %v637_v24, %s1404_s5 }
 0x266   : > { %v639_v25 = vpop.f32.mrf.mxu1 }
 0x268   : > { %v640_v26 = vpop.f32.mrf.mxu1 }
 0x269   : > { %1045 = vperm.xlu1 %1318, %v1256_v27  }
 0x2b5   : > { %v648_v29 = vpop.permute.xlu1 %647 }
 0x2b7   : > { %v644_v30 = vpop.permute.xlu0 %643 }
 0x2b8   : > { %v649_v37 = vsel %vm1896_vm3, %v648_v29, %v644_v30  ;;  %v652_v38 = vsel %vm1896_vm3, %v644_v30, %v648_v29  ;;  %vm1917_vm3 = vcmask 1039360  }
 0x2b9   : > { %v663_v31 = vpop.permute.xlu1 %662  ;;  %v653_v42 = vsel %vm1557_vm5, %v652_v38, 0.0  ;;  %v654_v43 = vsel %vm1563_vm7, %v649_v37, 0.0 }
 0x2ba   : > { %v655_v51 = vadd.f32 %v653_v42, %v615_v14  ;;  %v656_v52 = vadd.f32 %v654_v43, %v617_v15 }
 0x2bb   : > { %v659_v32 = vpop.permute.xlu0 %658 }
 0x2bc   : > { %v667_v41 = vsel %vm356_vm6, %v659_v32, %v663_v31  ;;  %v664_v57 = vsel %vm356_vm6, %v663_v31, %v659_v32 }
 0x2bd   : > { %v678_v34 = vpop.permute.xlu1 %677  ;;  %v668_v48 = vsel %vm1897_vm2, %v667_v41, 0.0  ;;  %v671_v8 = vadd.f32 %v664_v57, %v656_v52  ;;  %vm1918_vm2 = vmmov %vm1917_vm3 }
 0x2be   : > { %v670_v63 = vadd.f32 %v668_v48, %v655_v51 }
 0x2bf   : > { %v674_v33 = vpop.permute.xlu0 %673 }
 0x2c0   : > { %v682_v47 = vsel %vm376_vm9, %v674_v33, %v678_v34  ;;  %v679_v54 = vsel %vm376_vm9, %v678_v34, %v674_v33 }
 0x2c1   : > { %v693_v45 = vpop.permute.xlu1 %692  ;;  %v683_v58 = vsel %vm1584_vm12, %v682_v47, 0.0  ;;  %v684_v5 = vsel %vm1576_vm10, %v679_v54, 0.0 }
 0x2c2   : > { %v685_v9 = vadd.f32 %v683_v58, %v670_v63  ;;  %v686_v14 = vadd.f32 %v684_v5, %v671_v8  ;;  %v1330_v58 = vld [vmem:[%s1890_s1 + $0x50] sm:$0xff]   ;;  %v1332_v63 = vld [vmem:[%s1890_s1 + $0x60] sm:$0xff]  }
 0x2c3   : > { %v689_v40 = vpop.permute.xlu0 %688 }
 0x2c4   : > { %v697_v55 = vsel %vm1898_vm11, %v689_v40, %v693_v45  ;;  %v694_v3 = vsel %vm1898_vm11, %v693_v45, %v689_v40 }
 0x2c5   : > { %v698_v6 = vsel %vm1549_vm4, %v697_v55, 0.0  ;;  %v699_v11 = vsel %vm1563_vm7, %v694_v3, 0.0  ;;  %v1333_v3 = vld [vmem:[%s1890_s1 + $0x68] ss:$0 sps:$4 sm:$0xff]  }
 0x2c6   : > { %v700_v15 = vadd.f32 %v698_v6, %v685_v9  ;;  %v701_v21 = vadd.f32 %v699_v11, %v686_v14 }
 0x2c9   : > { %v705_v49 = vpop.permute.xlu0 %704 }
 0x2cb   : > { %v707_v62 = vpop.permute.xlu1 %706 }
 0x2cc   : > { %v708_v4 = vsel %vm1917_vm3, %v705_v49, %v707_v62  ;;  %v712_v10 = vsel %vm1918_vm2, %v707_v62, %v705_v49  ;;  %vm1919_vm3 = vcmask 924672   ;;  %vm1921_vm2 = vcmask 1043456   ;;  %v1331_v62 = vld [vmem:[%s1890_s1 + $0x58] sm:$0xff]  }
 0x2cd   : > { %v720_v7 = vpop.permute.xlu0 %719  ;;  %v713_v12 = vsel %vm1571_vm8, %v708_v4, 0.0  ;;  %vm1920_vm11 = vmmov %vm1919_vm3  ;;  %v714_v18 = vsel %vm1576_vm10, %v712_v10, 0.0 }
 0x2ce   : > { %v715_v22 = vadd.f32 %v713_v12, %v700_v15  ;;  %v716_v26 = vadd.f32 %v714_v18, %v701_v21 }
 0x2cf   : > { %v722_v13 = vpop.permute.xlu1 %721 }
 0x2d0   : > { %v723_v16 = vsel %vm1919_vm3, %v720_v7, %v722_v13  ;;  %v727_v17 = vsel %vm1920_vm11, %v722_v13, %v720_v7  ;;  %vm1922_vm11 = vmmov %vm1921_vm2  ;;  %vm818_vm3 = vcmask 195584  }
 0x2d1   : > { %v728_v20 = vsel %vm1549_vm4, %v723_v16, 0.0  ;;  %v729_v23 = vsel %vm1610_vm1, %v727_v17, 0.0  ;;  %v735_v24 = vpop.permute.xlu0 %734 }
 0x2d2   : > { %v730_v27 = vadd.f32 %v728_v20, %v715_v22  ;;  %v731_v32 = vadd.f32 %v729_v23, %v716_v26  ;;  %v1258_v23 = vld [vmem:[%s1891_s2 + $0x18] sm:$0xff] }
 0x2d3   : > { %v737_v25 = vpop.permute.xlu1 %736 }
 0x2d4   : > { %v742_v29 = vsel %vm459_vm0, %v737_v25, %v735_v24  ;;  %v738_v30 = vsel %vm459_vm0, %v735_v24, %v737_v25 }
 0x2d5   : > { %v744_v31 = vsel %vm182_vm14, %v742_v29, 0.0  ;;  %v745_v37 = vadd.f32 %v738_v30, %v730_v27 }
 0x2d6   : > { %v746_v38 = vadd.f32 %v744_v31, %v731_v32 }
 0x2d7   : > { %v750_v33 = vpop.permute.xlu1 %749  ;;  %v752_v34 = vpop.permute.xlu0 %751 }
 0x2d8   : > { %v753_v40 = vsel %vm479_vm13, %v750_v33, %v752_v34  ;;  %v757_v41 = vsel %vm479_vm13, %v752_v34, %v750_v33 }
 0x2d9   : > { %v758_v42 = vsel %vm1571_vm8, %v753_v40, 0.0  ;;  %v759_v43 = vsel %vm1629_vm15, %v757_v41, 0.0 }
 0x2da   : > { %v760_v45 = vadd.f32 %v758_v42, %v745_v37  ;;  %v761_v47 = vadd.f32 %v759_v43, %v746_v38 }
 0x2dc   : > { %v769_v48 = vadd.f32 %v1694_v28, %v760_v45  ;;  %v770_v49 = vadd.f32 %v1694_v28, %v761_v47  ;;  %v1329_v28 = vld [vmem:[%s1890_s1 + $0x48] sm:$0xff]  }
 0x2de   : > { %v1742_v51 = vmax.f32 %v769_v48, 0.0  ;;  %v1744_v52 = vmax.f32 %v770_v49, 0.0 }
 0x2e0   : > { %v784_v54 = vpack.c.bf16 %v1744_v52, %v1744_v52  ;;  %v783_v55 = vpack.c.bf16 %v1742_v51, %v1742_v51 }
 0x2e2   : > { %1250 = vmatprep.subr.msk.bf16.mxu0 %vm1921_vm2, %v784_v54  ;;  %v835_v57 = vsel %vm1922_vm11, %v783_v55, 0  ;;  %vm1923_vm2 = vcmask 138240  }
 0x2e3   : > { %853 = vmatpush1.bf16.msra.mxu0 %v835_v57  ;;  %vm1924_vm11 = vmmov %vm1923_vm2 }
 0x2e4   : > { %854 = vmatprep.subr.bf16.mxu0 %v1646_v61  ;;  %v1792_v25 = vpop.permute.xlu1 %1045 }
 0x2e7   : > { %855 = vmatpush1.bf16.msra.mxu0 %v1643_v59 }
 0x2ea   : > { %1251 = vmatmul.mubr.msk.bf16.vlgmr.msra.gmra.mxu0 %vm818_vm3, %v1329_v28 }
 0x2eb   : > { %882 = vmatprep.mubr.bf16.mxu0 %v1396_v0 }
 0x2f2   : > { %1252 = vmatmul.mubr.msk.bf16.gmra.mxu0 %vm818_vm3, %v1330_v58 }
 0x2f3   : > { %892 = vmatprep.mubr.bf16.mxu0 %v1396_v0 }
 0x2fa   : > { %1253 = vmatmul.mubr.msk.bf16.gmra.mxu0 %vm818_vm3, %v1331_v62 }
 0x2fb   : > { %902 = vmatprep.mubr.bf16.mxu0 %v1396_v0 }
 0x302   : > { %1254 = vmatmul.mubr.msk.bf16.gmra.mxu0 %vm818_vm3, %v1332_v63 }
 0x303   : > { %912 = vmatprep.mubr.bf16.mxu0 %v1396_v0 }
 0x30a   : > { %1255 = vmatmul.mubr.msk.bf16.gmra.mxu0 %vm818_vm3, %v1333_v3  ;;  %vm1925_vm3 = vcmp.ge.s32.totalorder %v1541_v36, 16 }
 0x3aa   : > { %v874_v4 = vpop.f32.mrf.mxu0 }
 0x3ab   : > { %926 = vrot.lane.b32.xlu0 %v874_v4, %s1397_s17 }
 0x3ac   : > { %v876_v5 = vpop.f32.mrf.mxu0 }
 0x3ad   : > { %922 = vrot.lane.b32.xlu1 %v876_v5, %s1397_s17 }
 0x3ae   : > { %v878_v6 = vpop.f32.mrf.mxu0 }
 0x3af   : > { %941 = vrot.lane.b32.xlu0 %v878_v6, %s1399_s20 }
 0x3b0   : > { %v880_v7 = vpop.f32.mrf.mxu0 }
 0x3b1   : > { %937 = vrot.lane.b32.xlu1 %v880_v7, %s1399_s20 }
 0x3b2   : > { %v884_v8 = vpop.f32.mrf.mxu0 }
 0x3b3   : > { %956 = vrot.lane.b32.xlu0 %v884_v8, %s1400_s24 }
 0x3b4   : > { %v886_v0 = vpop.f32.mrf.mxu0 }
 0x3b5   : > { %952 = vrot.lane.b32.xlu1 %v886_v0, %s1400_s24 }
 0x3b6   : > { %v888_v9 = vpop.f32.mrf.mxu0 }
 0x3b7   : > { %971 = vrot.lane.b32.xlu0 %v888_v9, %s1401_s25 }
 0x3b8   : > { %v890_v10 = vpop.f32.mrf.mxu0 }
 0x3b9   : > { %967 = vrot.lane.b32.xlu1 %v890_v10, %s1401_s25  ;;  %s161_s25 = sand.u32 1, %s1386_s13  }
 0x3ba   : > { %v894_v11 = vpop.f32.mrf.mxu0  ;;  %s1125_s28 = scalar_lea.sflag [#allocation4], %s161_s25 }
 0x3bc   : > { %v896_v12 = vpop.f32.mrf.mxu0 }
 0x3be   : > { %v898_v13 = vpop.f32.mrf.mxu0 }
 0x3bf   : > { %983 = vrot.lane.b32.xlu1 %v898_v13, %s1402_s26 }
 0x3c0   : > { %v900_v14 = vpop.f32.mrf.mxu0 }
 0x3c1   : > { %985 = vrot.lane.b32.xlu0 %v900_v14, %s1402_s26  ;;  %s1202_s26 = sshll.u32 %s161_s25, 4 }
 0x3c2   : > { %v904_v15 = vpop.f32.mrf.mxu0 }
 0x3c3   : > { %998 = vrot.lane.b32.xlu1 %v904_v15, %s1398_s19 }
 0x3c4   : > { %v906_v16 = vpop.f32.mrf.mxu0 }
 0x3c5   : > { %1000 = vrot.lane.b32.xlu0 %v906_v16, %s1398_s19 }
 0x3c6   : > { %v908_v17 = vpop.f32.mrf.mxu0 }
 0x3c7   : > { %1013 = vrot.lane.b32.xlu1 %v908_v17, %s1403_s27 }
 0x3c8   : > { %v910_v18 = vpop.f32.mrf.mxu0 }
 0x3c9   : > { %1015 = vrot.lane.b32.xlu0 %v910_v18, %s1403_s27  ;;  %s1266_s27 = sshll.u32 %s1447_s16, 8  ;;  %s1405_s16 = smov [#allocation3]  }
 0x3ca   : > { %v914_v20 = vpop.f32.mrf.mxu0  ;;  %s1854_s11 = scalar_lea.hbm %s1892_s3, %s1266_s27  ;;  %s1338_s30 = sshll.u32 %s1405_s16, 4  ;;  %s1339_s30 = int_to_ptr.vmem [resolvable:$false] %s1338_s30 }
 0x3cb   : > { %s1340_s4 = scalar_lea.vmem %s1339_s30, 512 }
 0x3cc   : > { %v916_v21 = vpop.f32.mrf.mxu0 }
 0x3cd   : > { %1028 = vrot.lane.b32.xlu0 %v914_v20, %s1404_s5  ;;  %1030 = vrot.lane.b32.xlu1 %v916_v21, %s1404_s5  ;;  %s163_s5 = scalar_lea.vmem [#allocation3], %s1202_s26 }
 0x3ce   : > { %v918_v22 = vpop.f32.mrf.mxu0  ;;  %s1139_s8 = sshll.u32 %s163_s5, 4  ;;  %s1140_s8 = int_to_ptr.vmem [resolvable:$true] %s1139_s8 }
 0x3cf   : > { %s1334_s29 = scalar_lea.vmem %s1140_s8, 256  ;;  %p1341_p0 = scmp.lt.s32.totalorder %s1140_s8, %s1339_s30 }
 0x3d0   : > { %v919_v24 = vpop.f32.mrf.mxu0  ;;  %p1335_p11 = scmp.ne.s32.totalorder %s1140_s8, %s1334_s29  ;;  %p1342_p1 = scmp.lt.s32.totalorder %s1340_s4, %s1334_s29 }
 0x3d1   : > { %1072 = vperm.xlu0 %1317, %v1258_v23  }
 0x3d2   : > { %p1336_p12 = pnand %p1335_p11, %p1464_p5  ;;  %p1343_p2 = por %p1342_p1, %p1341_p0 }
 0x3d4   : > { %p1337_p13 = pneg %p1336_p12 }
 0x3d6   : > { %p1344_p3 = pnand %p1343_p2, %p1337_p13 }
 0x41d   : > { %v927_v26 = vpop.permute.xlu0 %926 }
 0x41f   : > { %v923_v27 = vpop.permute.xlu1 %922 }
 0x420   : > { %v928_v33 = vsel %vm1923_vm2, %v927_v26, %v923_v27  ;;  %v931_v34 = vsel %vm1924_vm11, %v923_v27, %v927_v26  ;;  %vm1926_vm2 = vcmask 7168   ;;  %vm1928_vm11 = vcmask 1039360  }
 0x421   : > { %v942_v29 = vpop.permute.xlu0 %941  ;;  %v932_v40 = vsel %vm1557_vm5, %v931_v34, 0.0  ;;  %v933_v41 = vsel %vm1563_vm7, %v928_v33, 0.0  ;;  %vm1927_vm5 = vmmov %vm1926_vm2 }
 0x422   : > { %v934_v48 = vadd.f32 %v932_v40, %v894_v11  ;;  %v935_v49 = vadd.f32 %v933_v41, %v896_v12 }
 0x423   : > { %v938_v30 = vpop.permute.xlu1 %937 }
 0x424   : > { %v946_v38 = vsel %vm356_vm6, %v938_v30, %v942_v29  ;;  %v943_v57 = vsel %vm356_vm6, %v942_v29, %v938_v30  ;;  %vm1930_vm6 = vcmask 924672  }
 0x425   : > { %v957_v32 = vpop.permute.xlu0 %956  ;;  %v947_v45 = vsel %vm1925_vm3, %v946_v38, 0.0  ;;  %v950_v5 = vadd.f32 %v943_v57, %v935_v49 }
 0x426   : > { %v949_v58 = vadd.f32 %v947_v45, %v934_v48 }
 0x427   : > { %v953_v31 = vpop.permute.xlu1 %952 }
 0x428   : > { %v961_v43 = vsel %vm376_vm9, %v953_v31, %v957_v32  ;;  %v958_v54 = vsel %vm376_vm9, %v957_v32, %v953_v31  ;;  %vm1929_vm9 = vmmov %vm1928_vm11 }
 0x429   : > { %v972_v42 = vpop.permute.xlu0 %971  ;;  %v962_v46 = vsel %vm1584_vm12, %v961_v43, 0.0  ;;  %v963_v36 = vsel %vm1576_vm10, %v958_v54, 0.0  ;;  %vm1931_vm12 = vmmov %vm1930_vm6 }
 0x42a   : > { %v964_v6 = vadd.f32 %v962_v46, %v949_v58  ;;  %v965_v9 = vadd.f32 %v963_v36, %v950_v5 }
 0x42b   : > { %v968_v37 = vpop.permute.xlu1 %967 }
 0x42c   : > { %v976_v55 = vsel %vm1926_vm2, %v968_v37, %v972_v42  ;;  %v973_v62 = vsel %vm1927_vm5, %v972_v42, %v968_v37 }
 0x42d   : > { %v977_v3 = vsel %vm1549_vm4, %v976_v55, 0.0  ;;  %v978_v60 = vsel %vm1563_vm7, %v973_v62, 0.0 }
 0x42e   : > { %v979_v10 = vadd.f32 %v977_v3, %v964_v6  ;;  %v980_v15 = vadd.f32 %v978_v60, %v965_v9 }
 0x431   : > { %v984_v47 = vpop.permute.xlu1 %983 }
 0x433   : > { %v986_v28 = vpop.permute.xlu0 %985 }
 0x434   : > { %v987_v63 = vsel %vm1928_vm11, %v984_v47, %v986_v28  ;;  %v991_v7 = vsel %vm1929_vm9, %v986_v28, %v984_v47 }
 0x435   : > { %v999_v4 = vpop.permute.xlu1 %998  ;;  %v992_v8 = vsel %vm1571_vm8, %v987_v63, 0.0  ;;  %v993_v13 = vsel %vm1576_vm10, %v991_v7, 0.0 }
 0x436   : > { %v994_v16 = vadd.f32 %v992_v8, %v979_v10  ;;  %v995_v20 = vadd.f32 %v993_v13, %v980_v15 }
 0x437   : > { %v1001_v0 = vpop.permute.xlu0 %1000 }
 0x438   : > { %v1002_v11 = vsel %vm1930_vm6, %v999_v4, %v1001_v0  ;;  %v1006_v12 = vsel %vm1931_vm12, %v1001_v0, %v999_v4 }
 0x439   : > { %v1007_v14 = vsel %vm1549_vm4, %v1002_v11, 0.0  ;;  %v1008_v50 = vsel %vm1610_vm1, %v1006_v12, 0.0  ;;  %v1014_v17 = vpop.permute.xlu1 %1013 }
 0x43a   : > { %v1009_v21 = vadd.f32 %v1007_v14, %v994_v16  ;;  %v1010_v24 = vadd.f32 %v1008_v50, %v995_v20 }
 0x43b   : > { %v1016_v18 = vpop.permute.xlu0 %1015 }
 0x43c   : > { %v1021_v22 = vsel %vm459_vm0, %v1016_v18, %v1014_v17  ;;  %v1017_v23 = vsel %vm459_vm0, %v1014_v17, %v1016_v18  ;;  %vm1075_vm0 = vcmask 261120  }
 0x43d   : > { %v1023_v56 = vsel %vm182_vm14, %v1021_v22, 0.0  ;;  %v1024_v27 = vadd.f32 %v1017_v23, %v1009_v21 }
 0x43e   : > { %v1025_v29 = vadd.f32 %v1023_v56, %v1010_v24 }
 0x43f   : > { %v1029_v26 = vpop.permute.xlu0 %1028  ;;  %v1031_v44 = vpop.permute.xlu1 %1030 }
 0x440   : > { %v1032_v30 = vsel %vm479_vm13, %v1029_v26, %v1031_v44  ;;  %v1036_v19 = vsel %vm479_vm13, %v1031_v44, %v1029_v26 }
 0x441   : > { %v1037_v31 = vsel %vm1571_vm8, %v1032_v30, 0.0  ;;  %v1038_v32 = vsel %vm1629_vm15, %v1036_v19, 0.0 }
 0x442   : > { %v1039_v33 = vadd.f32 %v1037_v31, %v1024_v27  ;;  %v1040_v34 = vadd.f32 %v1038_v32, %v1025_v29 }
 0x444   : > { %v1048_v39 = vadd.f32 %v1792_v25, %v1039_v33  ;;  %v1049_v37 = vadd.f32 %v1792_v25, %v1040_v34 }
 0x446   : > { %v1050_v38 = vmax.f32 %v1048_v39, 0.0  ;;  %v1051_v40 = vmax.f32 %v1049_v37, 0.0 }
 0x448   : > { %v1065_v41 = vpack.c.bf16 %v1051_v40, %v1744_v52  ;;  %v1064_v42 = vpack.c.bf16 %v1050_v38, %v1742_v51 }
 0x44a   : > { %1091 = vmatprep.subr.bf16.mxu1 %v1065_v41 }
 0x44b   : > { %1092 = vmatpush1.bf16.msra.mxu1 %v1064_v42 }
 0x44c   : > { %1093 = vmatprep.subr.bf16.mxu1 %v1646_v61  ;;  %v1073_v35 = vpop.permute.xlu0 %1072 }
 0x44f   : > { %1094 = vmatpush1.bf16.msra.mxu1 %v1643_v59 }
 0x452   : > { %1259 = vmatmul.mubr.msk.bf16.vlgmr.msra.gmra.mxu1 %vm1075_vm0, %v1257_v53 }
 0x512   : > { %v1113_v25 = vpop.f32.mrf.mxu1 }
 0x513   : > { %v1114_v43 = vadd.f32 %v1113_v25, %v1073_v35 }
 0x514   : > { %v1115_v52 = vpop.f32.mrf.mxu1 }
 0x515   : > { %v1120_v61 = vadd.f32 %v1114_v43, %v1485_v2  ;;  %v1116_v51 = vadd.f32 %v1115_v52, %v1073_v35 }
 0x516   : > { %v1117_v59 = vpop.f32.mrf.mxu1 }
 0x517   : > { %1122 = vst [vmem:[%s163_s5] sm:$0xff] %v1120_v61  ;;  %v1121_v45 = vadd.f32 %v1116_v51, %v1483_v1 }
 0x518   : > { %v1118_v47 = vpop.f32.mrf.mxu1 }
 0x519   : > { %1123 = vst [vmem:[%s163_s5 + $0x8] sm:$0xff] %v1121_v45 }
 0x51a   : > { %1347 = shalt.err (!%p1344_p3)
}
 0x51b   : > { %s1348_s6 = scalar_lea.hbm %s1854_s11, 256  ;;  %s1352_s20 = scalar_lea.hbm %s1892_s3, 512 }
 0x51c   : > { %p1349_p4 = scmp.ne.s32.totalorder %s1854_s11, %s1348_s6  ;;  %p1353_p9 = scmp.lt.s32.totalorder %s1854_s11, %s1892_s3 }
 0x51d   : > { %p1354_p10 = scmp.lt.s32.totalorder %s1352_s20, %s1348_s6 }
 0x51e   : > { %p1350_p7 = pnand %p1349_p4, %p1464_p5 }
 0x51f   : > { %p1355_p11 = por %p1354_p10, %p1353_p9 }
 0x520   : > { %p1351_p8 = pneg %p1350_p7 }
 0x522   : > { %p1356_p12 = pnand %p1355_p11, %p1351_p8 }
 0x524   : > { %1359 = shalt.err (!%p1356_p12)
}
 0x525   : > { %1269 = dma.vmem_to_hbm [thread:$0]  (%p1464_p5), %s1140_s8, 256, %s1854_s11, %s1125_s28  }
 0x526 PF: > { %p1275_p13 = scmp.ge.s32.totalorder %s1394_s15, 2  ;;  %s1151_s25 = sand.u32 1, %s1382_s12  }
 0x527   : > { %s1152_s26 = scalar_lea.sflag [#allocation4], %s1151_s25 }
 0x528   : > { %p1272_p0 = pnand %p1275_p13, %p1468_p6 }
 0x52a   : > { %p1273_p1 = pneg %p1272_p0 }
 0x52c   : > { %1377 = dma.done.wait (%p1273_p1), %s1152_s26, 256  }
 0x52d   : > { %1379 = vsyncadd (%p1273_p1), %s1152_s26, 4294967040  ;;  %p13_p2 = scmp.ge.s32.totalorder %s1451_s18, 4   ;;  %s1932_s12 = smov %s1386_s13 }
 0x52e   : > { %s1933_s13 = smov %s1390_s14  ;;  %s1934_s14 = smov %s1462_s21 }
 0x52f   : > { %s1935_s15 = smov %s1451_s18  ;;  %15 = sbr.rel (!%p13_p2) target bundleno = 3 (0x3), region = 73 }
 0x534   :  { %1157 = vsyncpa [#allocation4], 1 }
 0x535   :  { %1159 = vsyncpa [#allocation4 + $0x1], 1 }

</bundles_post_ra>
